<compile_context>
chip_gen: v7x
topology: tpu7x:2x2x1
jax: 0.10.0
libtpu: 0.0.40
codegen_flags: <defaults>
</compile_context>

<pallas_src>
from functools import partial

import jax
import jax.numpy as jnp
from jax.experimental import pallas as pl
from jax.experimental.pallas import tpu as pltpu

GP = 128  # per-gate lane stride (one full vreg lane width per gate)


# ------------------------------ fused DDNE kernel ------------------------------
def ddne_kernel(x_ref, wih_ref, whh_ref, bgi_ref, bhn_ref,
                w1_ref, b1_ref, w2_ref, b2_ref,
                emb_ref, pred_ref, *, T, H):
    """Fused forward: hoisted input projection + unrolled GRU + MLP decoder.

    x_ref   : (T*M, N)   bf16, rows ordered (t, b, n)    (M = B * N)
    wih_ref : (N, 3*GP)  bf16, W_ih^T gate-packed at 128-lane stride (r, z, n)
    whh_ref : (GP, 3*GP) bf16, W_hh^T gate-packed, rows >= H are zero
    bgi_ref : (1, 3*GP)  f32,  (b_ih + [b_hh_r, b_hh_z, 0]) gate-packed
    bhn_ref : (1, GP)    f32,  b_hh_n zero-padded to 128 lanes
    w1_ref  : (T*H, Dd) bf16, b1_ref: (1, Dd) f32
    w2_ref  : (Dd, N)   bf16, b2_ref: (1, N)  f32
    emb_ref : (M, T*H)  f32  GRU outputs, lane-dense
    pred_ref: (M, N)    f32  decoder output
    """
    M = pred_ref.shape[0]

    # ---- hoisted input projection: one batched bf16 matmul over all (t, b, n) rows
    gi_all = jnp.dot(x_ref[...], wih_ref[...],
                     preferred_element_type=jnp.float32) + bgi_ref[...]   # (T*M, 3*GP) f32

    wh = whh_ref[...]                                                     # (GP, 3*GP) bf16
    bhn_b = jnp.broadcast_to(bhn_ref[...], (M, GP))                       # hoisted broadcast

    # ---- unrolled GRU recurrence (PyTorch gate order r, z, n), gates 128-lane aligned
    h = jnp.zeros((M, GP), jnp.float32)
    outs = []
    for t in range(T):
        gi_t = gi_all[t * M:(t + 1) * M, :]                               # contiguous sublane slice
        gh = jnp.dot(h.astype(jnp.bfloat16), wh,
                     preferred_element_type=jnp.float32)                  # (M, 3*GP)

        r = jax.nn.sigmoid(gi_t[:, 0 * GP:1 * GP] + gh[:, 0 * GP:1 * GP])
        z = jax.nn.sigmoid(gi_t[:, 1 * GP:2 * GP] + gh[:, 1 * GP:2 * GP])
        n = jnp.tanh(gi_t[:, 2 * GP:3 * GP] + r * (gh[:, 2 * GP:3 * GP] + bhn_b))
        h = (1.0 - z) * n + z * h
        outs.append(h[:, :H])                                             # keep real lanes only

    # (M, T*H) lane-dense embedding; single unmasked store (one-time lane pack).
    out_flat = jnp.concatenate(outs, axis=1)
    emb_ref[...] = out_flat

    # ---- decoder MLP: Linear -> ReLU -> Linear -> Sigmoid (bf16 operands, f32 acc)
    h1 = jnp.dot(out_flat.astype(jnp.bfloat16), w1_ref[...],
                 preferred_element_type=jnp.float32) + b1_ref[...]
    h1 = jnp.maximum(h1, 0.0)
    logits = jnp.dot(h1.astype(jnp.bfloat16), w2_ref[...],
                     preferred_element_type=jnp.float32) + b2_ref[...]
    pred_ref[...] = jax.nn.sigmoid(logits)


# ------------------------------ DDNE forward (glue) -----------------------------
@jax.jit
def ddne_forward(inputs, params):
    """inputs: (B, T, N, N) float32. Returns (x_pred (B,N,N), x_embedding (B,N,T*H))."""
    B, T, N, _ = inputs.shape
    H = params["w_hh"].shape[1]
    Dd = params["w1"].shape[0]
    M = B * N
    assert H <= GP, "gate-packing assumes enc_hidden_dim <= 128"

    # (t, b, n) row order so each timestep is a contiguous row block in the kernel.
    x_flat = jnp.transpose(inputs, (1, 0, 2, 3)).reshape(T * M, N).astype(jnp.bfloat16)

    # ---- gate-packed (128-lane stride) weights & biases -------------------------
    def pack_gate_cols(w):                       # (rows, 3H) -> (rows, 3*GP)
        out = jnp.zeros((w.shape[0], 3 * GP), w.dtype)
        for g in range(3):
            out = out.at[:, g * GP: g * GP + H].set(w[:, g * H:(g + 1) * H])
        return out

    wih_p = pack_gate_cols(params["w_ih"].T).astype(jnp.bfloat16)          # (N, 3*GP)
    whh_p = jnp.zeros((GP, 3 * GP), jnp.float32
                      ).at[:H, :].set(pack_gate_cols(params["w_hh"].T)
                                      ).astype(jnp.bfloat16)               # (GP, 3*GP)

    # Fold b_hh's r/z parts into the hoisted-projection bias; keep b_hh_n separate.
    b_ih, b_hh = params["b_ih"], params["b_hh"]
    b_gi = b_ih + jnp.concatenate([b_hh[:2 * H], jnp.zeros((H,), b_hh.dtype)])
    bgi_p = pack_gate_cols(b_gi[None, :]).astype(jnp.float32)              # (1, 3*GP)
    bhn_p = jnp.zeros((1, GP), jnp.float32).at[0, :H].set(b_hh[2 * H:])    # (1, GP)

    w1_t = params["w1"].T.astype(jnp.bfloat16)                             # (T*H, Dd)
    w2_t = params["w2"].T.astype(jnp.bfloat16)                             # (Dd, N)
    b1 = params["b1"][None, :].astype(jnp.float32)
    b2 = params["b2"][None, :].astype(jnp.float32)

    emb_flat, pred_flat = pl.pallas_call(
        partial(ddne_kernel, T=T, H=H),
        out_shape=(jax.ShapeDtypeStruct((M, T * H), jnp.float32),
                   jax.ShapeDtypeStruct((M, N), jnp.float32)),
        grid_spec=pltpu.PrefetchScalarGridSpec(
            num_scalar_prefetch=0,
            grid=(1,),
            in_specs=[
                pl.BlockSpec((T * M, N), lambda i: (0, 0)),       # x (t,b,n)-ordered
                pl.BlockSpec((N, 3 * GP), lambda i: (0, 0)),      # W_ih^T packed
                pl.BlockSpec((GP, 3 * GP), lambda i: (0, 0)),     # W_hh^T packed
                pl.BlockSpec((1, 3 * GP), lambda i: (0, 0)),      # b_gi packed
                pl.BlockSpec((1, GP), lambda i: (0, 0)),          # b_hh_n padded
                pl.BlockSpec((T * H, Dd), lambda i: (0, 0)),      # W1^T
                pl.BlockSpec((1, Dd), lambda i: (0, 0)),          # b1
                pl.BlockSpec((Dd, N), lambda i: (0, 0)),          # W2^T
                pl.BlockSpec((1, N), lambda i: (0, 0)),           # b2
            ],
            out_specs=[
                pl.BlockSpec((M, T * H), lambda i: (0, 0)),
                pl.BlockSpec((M, N), lambda i: (0, 0)),
            ],
        ),
        compiler_params=pltpu.CompilerParams(dimension_semantics=("arbitrary",)),
    )(x_flat, wih_p, whh_p, bgi_p, bhn_p, w1_t, b1, w2_t, b2)

    x_embedding = emb_flat.reshape(B, N, T * H)
    x_pred = pred_flat.reshape(B, N, N)
    return x_pred, x_embedding


# ------------------------------ pure-JAX reference ------------------------------
def ddne_reference(inputs, params):
    B, T, N, _ = inputs.shape
    H = params["w_hh"].shape[1]
    x = jnp.transpose(inputs, (1, 0, 2, 3)).reshape(T, B * N, N)

    def step(h, x_t):
        gi = x_t @ params["w_ih"].T + params["b_ih"]
        gh = h @ params["w_hh"].T + params["b_hh"]
        r = jax.nn.sigmoid(gi[:, :H] + gh[:, :H])
        z = jax.nn.sigmoid(gi[:, H:2 * H] + gh[:, H:2 * H])
        n = jnp.tanh(gi[:, 2 * H:] + r * gh[:, 2 * H:])
        h_new = (1.0 - z) * n + z * h
        return h_new, h_new

    h0 = jnp.zeros((B * N, H), jnp.float32)
    _, out = jax.lax.scan(step, h0, x)                 # (T, M, H)
    out_flat = jnp.transpose(out, (1, 0, 2)).reshape(B * N, T * H)
    x_embedding = out_flat.reshape(B, N, T * H)
    h1 = jnp.maximum(out_flat @ params["w1"].T + params["b1"], 0.0)
    x_pred = jax.nn.sigmoid(h1 @ params["w2"].T + params["b2"]).reshape(B, N, N)
    return x_pred, x_embedding


# ------------------------------------- main --------------------------------------
if __name__ == "__main__":
    B, T, N = 2, 4, 16           # batch, historical_len, num_nodes
    H_ENC, H_DEC = 32, 32        # enc_hidden_dim, dec_hidden_dim

    key = jax.random.PRNGKey(0)
    ks = jax.random.split(key, 9)
    s_enc = 1.0 / jnp.sqrt(H_ENC)
    s_dec = 1.0 / jnp.sqrt(T * H_ENC)

    params = {
        "w_ih": jax.random.uniform(ks[0], (3 * H_ENC, N), jnp.float32, -s_enc, s_enc),
        "w_hh": jax.random.uniform(ks[1], (3 * H_ENC, H_ENC), jnp.float32, -s_enc, s_enc),
        "b_ih": jax.random.uniform(ks[2], (3 * H_ENC,), jnp.float32, -s_enc, s_enc),
        "b_hh": jax.random.uniform(ks[3], (3 * H_ENC,), jnp.float32, -s_enc, s_enc),
        "w1": jax.random.uniform(ks[4], (H_DEC, T * H_ENC), jnp.float32, -s_dec, s_dec),
        "b1": jax.random.uniform(ks[5], (H_DEC,), jnp.float32, -s_dec, s_dec),
        "w2": jax.random.uniform(ks[6], (N, H_DEC), jnp.float32,
                                 -1.0 / jnp.sqrt(H_DEC), 1.0 / jnp.sqrt(H_DEC)),
        "b2": jax.random.uniform(ks[7], (N,), jnp.float32,
                                 -1.0 / jnp.sqrt(H_DEC), 1.0 / jnp.sqrt(H_DEC)),
    }

    inputs = jax.random.uniform(ks[8], (B, T, N, N), jnp.float32)

    x_pred, x_emb = ddne_forward(inputs, params)
    jax.block_until_ready((x_pred, x_emb))

    # sanity check against pure-JAX f32 reference (tolerance widened for bf16 MXU operands)
    x_pred_ref, x_emb_ref = ddne_reference(inputs, params)
    assert x_pred.shape == (B, N, N) and x_emb.shape == (B, N, T * H_ENC)
    assert jnp.allclose(x_pred, x_pred_ref, atol=2e-2, rtol=2e-2)
    assert jnp.allclose(x_emb, x_emb_ref, atol=2e-2, rtol=2e-2)

    print("KERNEL_OK")
</pallas_src>

<mosaic_0001>
module attributes {stable_mosaic.version = 11 : i64} {
  func.func @ddne_kernel(%arg0: i32, %arg1: memref<128x16xbf16, #tpu.memory_space<vmem>>, %arg2: memref<16x384xbf16, #tpu.memory_space<vmem>>, %arg3: memref<128x384xbf16, #tpu.memory_space<vmem>>, %arg4: memref<1x384xf32, #tpu.memory_space<vmem>>, %arg5: memref<1x128xf32, #tpu.memory_space<vmem>>, %arg6: memref<128x32xbf16, #tpu.memory_space<vmem>>, %arg7: memref<1x32xf32, #tpu.memory_space<vmem>>, %arg8: memref<32x16xbf16, #tpu.memory_space<vmem>>, %arg9: memref<1x16xf32, #tpu.memory_space<vmem>>, %arg10: memref<32x128xf32, #tpu.memory_space<vmem>>, %arg11: memref<32x16xf32, #tpu.memory_space<vmem>>) attributes {dimension_semantics = [#tpu.dimension_semantics<arbitrary>], iteration_bounds = array<i64: 1>, scalar_prefetch = 0 : i64, scratch_operands = 0 : i64, tpu.core_type = #tpu.core_type<tc>, window_params = [{pipeline_mode = #tpu.pipeline_mode<synchronous>, transform_indices = @transform_0, window_bounds = array<i64: 128, 16>}, {pipeline_mode = #tpu.pipeline_mode<synchronous>, transform_indices = @transform_1, window_bounds = array<i64: 16, 384>}, {pipeline_mode = #tpu.pipeline_mode<synchronous>, transform_indices = @transform_2, window_bounds = array<i64: 128, 384>}, {pipeline_mode = #tpu.pipeline_mode<synchronous>, transform_indices = @transform_3, window_bounds = array<i64: 1, 384>}, {pipeline_mode = #tpu.pipeline_mode<synchronous>, transform_indices = @transform_4, window_bounds = array<i64: 1, 128>}, {pipeline_mode = #tpu.pipeline_mode<synchronous>, transform_indices = @transform_5, window_bounds = array<i64: 128, 32>}, {pipeline_mode = #tpu.pipeline_mode<synchronous>, transform_indices = @transform_6, window_bounds = array<i64: 1, 32>}, {pipeline_mode = #tpu.pipeline_mode<synchronous>, transform_indices = @transform_7, window_bounds = array<i64: 32, 16>}, {pipeline_mode = #tpu.pipeline_mode<synchronous>, transform_indices = @transform_8, window_bounds = array<i64: 1, 16>}, {pipeline_mode = #tpu.pipeline_mode<synchronous>, transform_indices = @transform_9, window_bounds = array<i64: 32, 128>}, {pipeline_mode = #tpu.pipeline_mode<synchronous>, transform_indices = @transform_10, window_bounds = array<i64: 32, 16>}]} {
    %c0 = arith.constant 0 : index
    %c0_0 = arith.constant 0 : index
    %0 = vector.load %arg1[%c0, %c0_0] : memref<128x16xbf16, #tpu.memory_space<vmem>>, vector<128x16xbf16>
    %c0_1 = arith.constant 0 : index
    %c0_2 = arith.constant 0 : index
    %1 = vector.load %arg2[%c0_1, %c0_2] : memref<16x384xbf16, #tpu.memory_space<vmem>>, vector<16x384xbf16>
    %cst = arith.constant dense<0.000000e+00> : vector<128x384xf32>
    %2 = tpu.matmul %0, %1, %cst {dimension_numbers = #tpu.dot_dimension_numbers<[1], [0], [0], [1], [0, 0, 1, 1], [], []>} : vector<128x16xbf16>, vector<16x384xbf16>, vector<128x384xf32> -> vector<128x384xf32>
    %c0_3 = arith.constant 0 : index
    %c0_4 = arith.constant 0 : index
    %3 = vector.load %arg4[%c0_3, %c0_4] : memref<1x384xf32, #tpu.memory_space<vmem>>, vector<1x384xf32>
    %4 = vector.broadcast %3 : vector<1x384xf32> to vector<128x384xf32>
    %5 = arith.addf %2, %4 : vector<128x384xf32>
    %c0_5 = arith.constant 0 : index
    %c0_6 = arith.constant 0 : index
    %6 = vector.load %arg3[%c0_5, %c0_6] : memref<128x384xbf16, #tpu.memory_space<vmem>>, vector<128x384xbf16>
    %c0_7 = arith.constant 0 : index
    %c0_8 = arith.constant 0 : index
    %7 = vector.load %arg5[%c0_7, %c0_8] : memref<1x128xf32, #tpu.memory_space<vmem>>, vector<1x128xf32>
    %8 = vector.shape_cast %7 : vector<1x128xf32> to vector<1x128xf32>
    %9 = vector.broadcast %8 : vector<1x128xf32> to vector<32x128xf32>
    %cst_9 = arith.constant 0.000000e+00 : f32
    %10 = vector.broadcast %cst_9 : f32 to vector<32x128xf32>
    %11 = vector.extract_strided_slice %5 {offsets = [0, 0], sizes = [32, 384], strides = [1, 1]} : vector<128x384xf32> to vector<32x384xf32>
    %12 = arith.truncf %10 : vector<32x128xf32> to vector<32x128xbf16>
    %cst_10 = arith.constant dense<0.000000e+00> : vector<32x384xf32>
    %13 = tpu.matmul %12, %6, %cst_10 {dimension_numbers = #tpu.dot_dimension_numbers<[1], [0], [0], [1], [0, 0, 1, 1], [], []>} : vector<32x128xbf16>, vector<128x384xbf16>, vector<32x384xf32> -> vector<32x384xf32>
    %14 = vector.extract_strided_slice %11 {offsets = [0, 0], sizes = [32, 128], strides = [1, 1]} : vector<32x384xf32> to vector<32x128xf32>
    %15 = vector.extract_strided_slice %13 {offsets = [0, 0], sizes = [32, 128], strides = [1, 1]} : vector<32x384xf32> to vector<32x128xf32>
    %16 = arith.addf %14, %15 : vector<32x128xf32>
    %17 = arith.negf %16 : vector<32x128xf32>
    %18 = math.exp %17 : vector<32x128xf32>
    %cst_11 = arith.constant 1.000000e+00 : f32
    %19 = vector.broadcast %cst_11 : f32 to vector<32x128xf32>
    %20 = arith.addf %19, %18 : vector<32x128xf32>
    %21 = arith.divf %19, %20 : vector<32x128xf32>
    %22 = vector.extract_strided_slice %11 {offsets = [0, 128], sizes = [32, 128], strides = [1, 1]} : vector<32x384xf32> to vector<32x128xf32>
    %23 = vector.extract_strided_slice %13 {offsets = [0, 128], sizes = [32, 128], strides = [1, 1]} : vector<32x384xf32> to vector<32x128xf32>
    %24 = arith.addf %22, %23 : vector<32x128xf32>
    %25 = arith.negf %24 : vector<32x128xf32>
    %26 = math.exp %25 : vector<32x128xf32>
    %cst_12 = arith.constant 1.000000e+00 : f32
    %27 = vector.broadcast %cst_12 : f32 to vector<32x128xf32>
    %28 = arith.addf %27, %26 : vector<32x128xf32>
    %29 = arith.divf %27, %28 : vector<32x128xf32>
    %30 = vector.extract_strided_slice %11 {offsets = [0, 256], sizes = [32, 128], strides = [1, 1]} : vector<32x384xf32> to vector<32x128xf32>
    %31 = vector.extract_strided_slice %13 {offsets = [0, 256], sizes = [32, 128], strides = [1, 1]} : vector<32x384xf32> to vector<32x128xf32>
    %32 = arith.addf %31, %9 : vector<32x128xf32>
    %33 = arith.mulf %21, %32 : vector<32x128xf32>
    %34 = arith.addf %30, %33 : vector<32x128xf32>
    %35 = math.tanh %34 : vector<32x128xf32>
    %cst_13 = arith.constant 1.000000e+00 : f32
    %36 = vector.broadcast %cst_13 : f32 to vector<32x128xf32>
    %37 = arith.subf %36, %29 : vector<32x128xf32>
    %38 = arith.mulf %37, %35 : vector<32x128xf32>
    %39 = arith.mulf %29, %10 : vector<32x128xf32>
    %40 = arith.addf %38, %39 : vector<32x128xf32>
    %41 = vector.extract_strided_slice %40 {offsets = [0, 0], sizes = [32, 32], strides = [1, 1]} : vector<32x128xf32> to vector<32x32xf32>
    %42 = vector.extract_strided_slice %5 {offsets = [32, 0], sizes = [32, 384], strides = [1, 1]} : vector<128x384xf32> to vector<32x384xf32>
    %43 = arith.truncf %40 : vector<32x128xf32> to vector<32x128xbf16>
    %cst_14 = arith.constant dense<0.000000e+00> : vector<32x384xf32>
    %44 = tpu.matmul %43, %6, %cst_14 {dimension_numbers = #tpu.dot_dimension_numbers<[1], [0], [0], [1], [0, 0, 1, 1], [], []>} : vector<32x128xbf16>, vector<128x384xbf16>, vector<32x384xf32> -> vector<32x384xf32>
    %45 = vector.extract_strided_slice %42 {offsets = [0, 0], sizes = [32, 128], strides = [1, 1]} : vector<32x384xf32> to vector<32x128xf32>
    %46 = vector.extract_strided_slice %44 {offsets = [0, 0], sizes = [32, 128], strides = [1, 1]} : vector<32x384xf32> to vector<32x128xf32>
    %47 = arith.addf %45, %46 : vector<32x128xf32>
    %48 = arith.negf %47 : vector<32x128xf32>
    %49 = math.exp %48 : vector<32x128xf32>
    %cst_15 = arith.constant 1.000000e+00 : f32
    %50 = vector.broadcast %cst_15 : f32 to vector<32x128xf32>
    %51 = arith.addf %50, %49 : vector<32x128xf32>
    %52 = arith.divf %50, %51 : vector<32x128xf32>
    %53 = vector.extract_strided_slice %42 {offsets = [0, 128], sizes = [32, 128], strides = [1, 1]} : vector<32x384xf32> to vector<32x128xf32>
    %54 = vector.extract_strided_slice %44 {offsets = [0, 128], sizes = [32, 128], strides = [1, 1]} : vector<32x384xf32> to vector<32x128xf32>
    %55 = arith.addf %53, %54 : vector<32x128xf32>
    %56 = arith.negf %55 : vector<32x128xf32>
    %57 = math.exp %56 : vector<32x128xf32>
    %cst_16 = arith.constant 1.000000e+00 : f32
    %58 = vector.broadcast %cst_16 : f32 to vector<32x128xf32>
    %59 = arith.addf %58, %57 : vector<32x128xf32>
    %60 = arith.divf %58, %59 : vector<32x128xf32>
    %61 = vector.extract_strided_slice %42 {offsets = [0, 256], sizes = [32, 128], strides = [1, 1]} : vector<32x384xf32> to vector<32x128xf32>
    %62 = vector.extract_strided_slice %44 {offsets = [0, 256], sizes = [32, 128], strides = [1, 1]} : vector<32x384xf32> to vector<32x128xf32>
    %63 = arith.addf %62, %9 : vector<32x128xf32>
    %64 = arith.mulf %52, %63 : vector<32x128xf32>
    %65 = arith.addf %61, %64 : vector<32x128xf32>
    %66 = math.tanh %65 : vector<32x128xf32>
    %cst_17 = arith.constant 1.000000e+00 : f32
    %67 = vector.broadcast %cst_17 : f32 to vector<32x128xf32>
    %68 = arith.subf %67, %60 : vector<32x128xf32>
    %69 = arith.mulf %68, %66 : vector<32x128xf32>
    %70 = arith.mulf %60, %40 : vector<32x128xf32>
    %71 = arith.addf %69, %70 : vector<32x128xf32>
    %72 = vector.extract_strided_slice %71 {offsets = [0, 0], sizes = [32, 32], strides = [1, 1]} : vector<32x128xf32> to vector<32x32xf32>
    %73 = vector.extract_strided_slice %5 {offsets = [64, 0], sizes = [32, 384], strides = [1, 1]} : vector<128x384xf32> to vector<32x384xf32>
    %74 = arith.truncf %71 : vector<32x128xf32> to vector<32x128xbf16>
    %cst_18 = arith.constant dense<0.000000e+00> : vector<32x384xf32>
    %75 = tpu.matmul %74, %6, %cst_18 {dimension_numbers = #tpu.dot_dimension_numbers<[1], [0], [0], [1], [0, 0, 1, 1], [], []>} : vector<32x128xbf16>, vector<128x384xbf16>, vector<32x384xf32> -> vector<32x384xf32>
    %76 = vector.extract_strided_slice %73 {offsets = [0, 0], sizes = [32, 128], strides = [1, 1]} : vector<32x384xf32> to vector<32x128xf32>
    %77 = vector.extract_strided_slice %75 {offsets = [0, 0], sizes = [32, 128], strides = [1, 1]} : vector<32x384xf32> to vector<32x128xf32>
    %78 = arith.addf %76, %77 : vector<32x128xf32>
    %79 = arith.negf %78 : vector<32x128xf32>
    %80 = math.exp %79 : vector<32x128xf32>
    %cst_19 = arith.constant 1.000000e+00 : f32
    %81 = vector.broadcast %cst_19 : f32 to vector<32x128xf32>
    %82 = arith.addf %81, %80 : vector<32x128xf32>
    %83 = arith.divf %81, %82 : vector<32x128xf32>
    %84 = vector.extract_strided_slice %73 {offsets = [0, 128], sizes = [32, 128], strides = [1, 1]} : vector<32x384xf32> to vector<32x128xf32>
    %85 = vector.extract_strided_slice %75 {offsets = [0, 128], sizes = [32, 128], strides = [1, 1]} : vector<32x384xf32> to vector<32x128xf32>
    %86 = arith.addf %84, %85 : vector<32x128xf32>
    %87 = arith.negf %86 : vector<32x128xf32>
    %88 = math.exp %87 : vector<32x128xf32>
    %cst_20 = arith.constant 1.000000e+00 : f32
    %89 = vector.broadcast %cst_20 : f32 to vector<32x128xf32>
    %90 = arith.addf %89, %88 : vector<32x128xf32>
    %91 = arith.divf %89, %90 : vector<32x128xf32>
    %92 = vector.extract_strided_slice %73 {offsets = [0, 256], sizes = [32, 128], strides = [1, 1]} : vector<32x384xf32> to vector<32x128xf32>
    %93 = vector.extract_strided_slice %75 {offsets = [0, 256], sizes = [32, 128], strides = [1, 1]} : vector<32x384xf32> to vector<32x128xf32>
    %94 = arith.addf %93, %9 : vector<32x128xf32>
    %95 = arith.mulf %83, %94 : vector<32x128xf32>
    %96 = arith.addf %92, %95 : vector<32x128xf32>
    %97 = math.tanh %96 : vector<32x128xf32>
    %cst_21 = arith.constant 1.000000e+00 : f32
    %98 = vector.broadcast %cst_21 : f32 to vector<32x128xf32>
    %99 = arith.subf %98, %91 : vector<32x128xf32>
    %100 = arith.mulf %99, %97 : vector<32x128xf32>
    %101 = arith.mulf %91, %71 : vector<32x128xf32>
    %102 = arith.addf %100, %101 : vector<32x128xf32>
    %103 = vector.extract_strided_slice %102 {offsets = [0, 0], sizes = [32, 32], strides = [1, 1]} : vector<32x128xf32> to vector<32x32xf32>
    %104 = vector.extract_strided_slice %5 {offsets = [96, 0], sizes = [32, 384], strides = [1, 1]} : vector<128x384xf32> to vector<32x384xf32>
    %105 = arith.truncf %102 : vector<32x128xf32> to vector<32x128xbf16>
    %cst_22 = arith.constant dense<0.000000e+00> : vector<32x384xf32>
    %106 = tpu.matmul %105, %6, %cst_22 {dimension_numbers = #tpu.dot_dimension_numbers<[1], [0], [0], [1], [0, 0, 1, 1], [], []>} : vector<32x128xbf16>, vector<128x384xbf16>, vector<32x384xf32> -> vector<32x384xf32>
    %107 = vector.extract_strided_slice %104 {offsets = [0, 0], sizes = [32, 128], strides = [1, 1]} : vector<32x384xf32> to vector<32x128xf32>
    %108 = vector.extract_strided_slice %106 {offsets = [0, 0], sizes = [32, 128], strides = [1, 1]} : vector<32x384xf32> to vector<32x128xf32>
    %109 = arith.addf %107, %108 : vector<32x128xf32>
    %110 = arith.negf %109 : vector<32x128xf32>
    %111 = math.exp %110 : vector<32x128xf32>
    %cst_23 = arith.constant 1.000000e+00 : f32
    %112 = vector.broadcast %cst_23 : f32 to vector<32x128xf32>
    %113 = arith.addf %112, %111 : vector<32x128xf32>
    %114 = arith.divf %112, %113 : vector<32x128xf32>
    %115 = vector.extract_strided_slice %104 {offsets = [0, 128], sizes = [32, 128], strides = [1, 1]} : vector<32x384xf32> to vector<32x128xf32>
    %116 = vector.extract_strided_slice %106 {offsets = [0, 128], sizes = [32, 128], strides = [1, 1]} : vector<32x384xf32> to vector<32x128xf32>
    %117 = arith.addf %115, %116 : vector<32x128xf32>
    %118 = arith.negf %117 : vector<32x128xf32>
    %119 = math.exp %118 : vector<32x128xf32>
    %cst_24 = arith.constant 1.000000e+00 : f32
    %120 = vector.broadcast %cst_24 : f32 to vector<32x128xf32>
    %121 = arith.addf %120, %119 : vector<32x128xf32>
    %122 = arith.divf %120, %121 : vector<32x128xf32>
    %123 = vector.extract_strided_slice %104 {offsets = [0, 256], sizes = [32, 128], strides = [1, 1]} : vector<32x384xf32> to vector<32x128xf32>
    %124 = vector.extract_strided_slice %106 {offsets = [0, 256], sizes = [32, 128], strides = [1, 1]} : vector<32x384xf32> to vector<32x128xf32>
    %125 = arith.addf %124, %9 : vector<32x128xf32>
    %126 = arith.mulf %114, %125 : vector<32x128xf32>
    %127 = arith.addf %123, %126 : vector<32x128xf32>
    %128 = math.tanh %127 : vector<32x128xf32>
    %cst_25 = arith.constant 1.000000e+00 : f32
    %129 = vector.broadcast %cst_25 : f32 to vector<32x128xf32>
    %130 = arith.subf %129, %122 : vector<32x128xf32>
    %131 = arith.mulf %130, %128 : vector<32x128xf32>
    %132 = arith.mulf %122, %102 : vector<32x128xf32>
    %133 = arith.addf %131, %132 : vector<32x128xf32>
    %134 = vector.extract_strided_slice %133 {offsets = [0, 0], sizes = [32, 32], strides = [1, 1]} : vector<32x128xf32> to vector<32x32xf32>
    %135 = tpu.concatenate %41, %72, %103, %134 in 1 : vector<32x32xf32>, vector<32x32xf32>, vector<32x32xf32>, vector<32x32xf32> -> vector<32x128xf32>
    %c0_26 = arith.constant 0 : index
    %c0_27 = arith.constant 0 : index
    %136 = vector.load %arg10[%c0_26, %c0_27] : memref<32x128xf32, #tpu.memory_space<vmem>>, vector<32x128xf32>
    tpu.vector_store %arg10[%c0_26, %c0_27], %135 {strides = array<i32>} : memref<32x128xf32, #tpu.memory_space<vmem>>, vector<32x128xf32>,
    %137 = arith.truncf %135 : vector<32x128xf32> to vector<32x128xbf16>
    %c0_28 = arith.constant 0 : index
    %c0_29 = arith.constant 0 : index
    %138 = vector.load %arg6[%c0_28, %c0_29] : memref<128x32xbf16, #tpu.memory_space<vmem>>, vector<128x32xbf16>
    %cst_30 = arith.constant dense<0.000000e+00> : vector<32x32xf32>
    %139 = tpu.matmul %137, %138, %cst_30 {dimension_numbers = #tpu.dot_dimension_numbers<[1], [0], [0], [1], [0, 0, 1, 1], [], []>} : vector<32x128xbf16>, vector<128x32xbf16>, vector<32x32xf32> -> vector<32x32xf32>
    %c0_31 = arith.constant 0 : index
    %c0_32 = arith.constant 0 : index
    %140 = vector.load %arg7[%c0_31, %c0_32] : memref<1x32xf32, #tpu.memory_space<vmem>>, vector<1x32xf32>
    %141 = vector.broadcast %140 : vector<1x32xf32> to vector<32x32xf32>
    %142 = arith.addf %139, %141 : vector<32x32xf32>
    %cst_33 = arith.constant 0.000000e+00 : f32
    %143 = vector.broadcast %cst_33 : f32 to vector<32x32xf32>
    %144 = arith.maximumf %142, %143 : vector<32x32xf32>
    %145 = arith.truncf %144 : vector<32x32xf32> to vector<32x32xbf16>
    %c0_34 = arith.constant 0 : index
    %c0_35 = arith.constant 0 : index
    %146 = vector.load %arg8[%c0_34, %c0_35] : memref<32x16xbf16, #tpu.memory_space<vmem>>, vector<32x16xbf16>
    %cst_36 = arith.constant dense<0.000000e+00> : vector<32x16xf32>
    %147 = tpu.matmul %145, %146, %cst_36 {dimension_numbers = #tpu.dot_dimension_numbers<[1], [0], [0], [1], [0, 0, 1, 1], [], []>} : vector<32x32xbf16>, vector<32x16xbf16>, vector<32x16xf32> -> vector<32x16xf32>
    %c0_37 = arith.constant 0 : index
    %c0_38 = arith.constant 0 : index
    %148 = vector.load %arg9[%c0_37, %c0_38] : memref<1x16xf32, #tpu.memory_space<vmem>>, vector<1x16xf32>
    %149 = vector.broadcast %148 : vector<1x16xf32> to vector<32x16xf32>
    %150 = arith.addf %147, %149 : vector<32x16xf32>
    %151 = arith.negf %150 : vector<32x16xf32>
    %152 = math.exp %151 : vector<32x16xf32>
    %cst_39 = arith.constant 1.000000e+00 : f32
    %153 = vector.broadcast %cst_39 : f32 to vector<32x16xf32>
    %154 = arith.addf %153, %152 : vector<32x16xf32>
    %155 = arith.divf %153, %154 : vector<32x16xf32>
    %c0_40 = arith.constant 0 : index
    %c0_41 = arith.constant 0 : index
    %156 = vector.load %arg11[%c0_40, %c0_41] : memref<32x16xf32, #tpu.memory_space<vmem>>, vector<32x16xf32>
    tpu.vector_store %arg11[%c0_40, %c0_41], %155 {strides = array<i32>} : memref<32x16xf32, #tpu.memory_space<vmem>>, vector<32x16xf32>,
    return
  }
  func.func @transform_0(%arg0: i32) -> (i32, i32) {
    %c0_i32 = arith.constant 0 : i32
    %c0_i32_0 = arith.constant 0 : i32
    %c0_i32_1 = arith.constant 0 : i32
    return %c0_i32, %c0_i32_0 : i32, i32
  }
  func.func @transform_1(%arg0: i32) -> (i32, i32) {
    %c0_i32 = arith.constant 0 : i32
    %c0_i32_0 = arith.constant 0 : i32
    %c0_i32_1 = arith.constant 0 : i32
    return %c0_i32, %c0_i32_0 : i32, i32
  }
  func.func @transform_2(%arg0: i32) -> (i32, i32) {
    %c0_i32 = arith.constant 0 : i32
    %c0_i32_0 = arith.constant 0 : i32
    %c0_i32_1 = arith.constant 0 : i32
    return %c0_i32, %c0_i32_0 : i32, i32
  }
  func.func @transform_3(%arg0: i32) -> (i32, i32) {
    %c0_i32 = arith.constant 0 : i32
    %c0_i32_0 = arith.constant 0 : i32
    %c0_i32_1 = arith.constant 0 : i32
    return %c0_i32, %c0_i32_0 : i32, i32
  }
  func.func @transform_4(%arg0: i32) -> (i32, i32) {
    %c0_i32 = arith.constant 0 : i32
    %c0_i32_0 = arith.constant 0 : i32
    %c0_i32_1 = arith.constant 0 : i32
    return %c0_i32, %c0_i32_0 : i32, i32
  }
  func.func @transform_5(%arg0: i32) -> (i32, i32) {
    %c0_i32 = arith.constant 0 : i32
    %c0_i32_0 = arith.constant 0 : i32
    %c0_i32_1 = arith.constant 0 : i32
    return %c0_i32, %c0_i32_0 : i32, i32
  }
  func.func @transform_6(%arg0: i32) -> (i32, i32) {
    %c0_i32 = arith.constant 0 : i32
    %c0_i32_0 = arith.constant 0 : i32
    %c0_i32_1 = arith.constant 0 : i32
    return %c0_i32, %c0_i32_0 : i32, i32
  }
  func.func @transform_7(%arg0: i32) -> (i32, i32) {
    %c0_i32 = arith.constant 0 : i32
    %c0_i32_0 = arith.constant 0 : i32
    %c0_i32_1 = arith.constant 0 : i32
    return %c0_i32, %c0_i32_0 : i32, i32
  }
  func.func @transform_8(%arg0: i32) -> (i32, i32) {
    %c0_i32 = arith.constant 0 : i32
    %c0_i32_0 = arith.constant 0 : i32
    %c0_i32_1 = arith.constant 0 : i32
    return %c0_i32, %c0_i32_0 : i32, i32
  }
  func.func @transform_9(%arg0: i32) -> (i32, i32) {
    %c0_i32 = arith.constant 0 : i32
    %c0_i32_0 = arith.constant 0 : i32
    %c0_i32_1 = arith.constant 0 : i32
    return %c0_i32, %c0_i32_0 : i32, i32
  }
  func.func @transform_10(%arg0: i32) -> (i32, i32) {
    %c0_i32 = arith.constant 0 : i32
    %c0_i32_0 = arith.constant 0 : i32
    %c0_i32_1 = arith.constant 0 : i32
    return %c0_i32, %c0_i32_0 : i32, i32
  }
}

</mosaic_0001>

<bundles_post_ra>
// kernel: ddne_forward.1
= control target key start
LH: loop header
LB: loop body
LE: loop exit
PB: predicated region body
PF: predicated region fallthrough
CT: control target
= control target key end

     0   :  { %16 = vsyncpa [#allocation3], 0  ;;  %v2939_v2 = vmov 0   ;;  %vm130_vm0 = vcmask 130048   ;;  %s2928_s0 = inlined_call_operand.vmem [shape: bf16[128,16], index: 0, kind: input, shape index: {}]   ;;  %s2929_s1 = inlined_call_operand.vmem [shape: bf16[16,384], index: 1, kind: input, shape index: {}]   ;;  %s2930_s2 = inlined_call_operand.vmem [shape: bf16[128,384], index: 2, kind: input, shape index: {}]   ;;  %s2931_s3 = inlined_call_operand.vmem [shape: f32[1,384], index: 3, kind: input, shape index: {}]   ;;  %s2932_s4 = inlined_call_operand.vmem [shape: f32[1,128], index: 4, kind: input, shape index: {}]   ;;  %s2933_s5 = inlined_call_operand.vmem [shape: bf16[128,32], index: 5, kind: input, shape index: {}]   ;;  %s2934_s6 = inlined_call_operand.vmem [shape: f32[1,32], index: 6, kind: input, shape index: {}]   ;;  %s2935_s7 = inlined_call_operand.vmem [shape: bf16[32,16], index: 7, kind: input, shape index: {}]   ;;  %s2936_s8 = inlined_call_operand.vmem [shape: f32[1,16], index: 8, kind: input, shape index: {}]   ;;  %s2937_s9 = inlined_call_operand.hbm [shape: f32[32,128], index: 9, kind: output, shape index: {0}]   ;;  %s2938_s10 = inlined_call_operand.hbm [shape: f32[32,16], index: 10, kind: output, shape index: {1}]  }
   0x1   :  { %v1994_v0 = vld [vmem:[%s2929_s1 + $0x4] ss:$12 sps:$4 sm:$0xff]   ;;  %v1996_v1 = vld [vmem:[%s2929_s1] ss:$12 sps:$4 sm:$0xff]   ;;  %187 = vmatprep.mubr.bf16.mxu0 %v2939_v2  ;;  %v2360_v6 = vld [vmem:[%s2930_s2 + $0x1c] ss:$12 sps:$4 sm:$0xff]  }
   0x2   :  { %155 = vmatprep.subr.bf16.mxu0 %v1994_v0  ;;  %v1997_v3 = vld [vmem:[%s2928_s0] sm:$0xff]   ;;  %v2001_v9 = vld [vmem:[%s2928_s0 + $0x8] sm:$0xff]   ;;  %v2383_v10 = vld [vmem:[%s2930_s2 + $0x30] ss:$12 sps:$4 sm:$0xff]  }
   0x3   :  { %156 = vmatpush1.bf16.msra.mxu0 %v1996_v1  ;;  %v2348_v4 = vld [vmem:[%s2930_s2 + $0x4] ss:$12 sps:$4 sm:$0xff]   ;;  %v2353_v5 = vld [vmem:[%s2930_s2] ss:$12 sps:$4 sm:$0xff]   ;;  %1798 = vmatprep.mubr.msk.bf16.mxu1 %vm130_vm0, %v1997_v3  ;;  %v2397_v12 = vld [vmem:[%s2930_s2 + $0x48] ss:$12 sps:$4 sm:$0xff]  }
   0x4   :  { %532 = vmatprep.subr.bf16.mxu0 %v2348_v4  ;;  %v2368_v7 = vld [vmem:[%s2930_s2 + $0x18] ss:$12 sps:$4 sm:$0xff]   ;;  %v2374_v8 = vld [vmem:[%s2930_s2 + $0x34] ss:$12 sps:$4 sm:$0xff]   ;;  %v2426_v18 = vld [vmem:[%s2930_s2 + $0x7c] ss:$12 sps:$4 sm:$0xff]  }
   0x5   :  { %v2389_v11 = vld [vmem:[%s2930_s2 + $0x4c] ss:$12 sps:$4 sm:$0xff]   ;;  %v2403_v13 = vld [vmem:[%s2930_s2 + $0x64] ss:$12 sps:$4 sm:$0xff]   ;;  %v2025_v16 = vld [vmem:[%s2929_s1 + $0x8] ss:$12 sps:$4 sm:$0xff]  }
   0x6   :  { %1642 = vmatmul.mubr.msk.bf16.vlgmr.msra.gmra.mrb[0].mxu0 %vm130_vm0, %v1997_v3  ;;  %v2005_v14 = vld [vmem:[%s2928_s0 + $0x10] sm:$0xff]   ;;  %v2411_v15 = vld [vmem:[%s2930_s2 + $0x60] ss:$12 sps:$4 sm:$0xff]   ;;  %1796 = vmatprep.subr.bf16.mxu1 %v2025_v16  ;;  %v2440_v20 = vld [vmem:[%s2930_s2 + $0x78] ss:$12 sps:$4 sm:$0xff]  }
   0x7   :  { %533 = vmatpush1.bf16.msra.mxu0 %v2353_v5  ;;  %197 = vmatprep.mubr.bf16.mxu0 %v2939_v2  ;;  %v2420_v17 = vld [vmem:[%s2930_s2 + $0x8] ss:$12 sps:$4 sm:$0xff]   ;;  %v2433_v19 = vld [vmem:[%s2930_s2 + $0x20] ss:$12 sps:$4 sm:$0xff]   ;;  %v2009_v22 = vld [vmem:[%s2928_s0 + $0x18] sm:$0xff]  }
   0x8   :  { %534 = vmatprep.subr.bf16.mxu0 %v2360_v6  ;;  %1797 = vmatpush3.bf16.msra.mxu1 %v2025_v16  ;;  %v2446_v21 = vld [vmem:[%s2930_s2 + $0x94] ss:$12 sps:$4 sm:$0xff]   ;;  %v2458_v23 = vld [vmem:[%s2930_s2 + $0x38] ss:$12 sps:$4 sm:$0xff]   ;;  %v2464_v24 = vld [vmem:[%s2930_s2 + $0x90] ss:$12 sps:$4 sm:$0xff]  }
   0x9   :  { %1814 = vmatprep.subr.bf16.mxu1 %v2420_v17  ;;  %v2470_v25 = vld [vmem:[%s2930_s2 + $0xac] ss:$12 sps:$4 sm:$0xff]   ;;  %v2013_v26 = vld [vmem:[%s2928_s0 + $0x20] sm:$0xff]   ;;  %v2478_v27 = vld [vmem:[%s2930_s2 + $0xa8] ss:$12 sps:$4 sm:$0xff]  }
   0xa   :  { %v2484_v28 = vld [vmem:[%s2930_s2 + $0x50] ss:$12 sps:$4 sm:$0xff]   ;;  %v2495_v29 = vld [vmem:[%s2930_s2 + $0x68] ss:$12 sps:$4 sm:$0xff]  }
   0xb   :  { %535 = vmatpush1.bf16.msra.mxu0 %v2368_v7  ;;  %1799 = vmatmul.mubr.msk.bf16.vlgmr.msra.gmra.mrb[0].mxu1 %vm130_vm0, %v2001_v9 }
   0xc   :  { %536 = vmatprep.subr.bf16.mxu0 %v2374_v8  ;;  %1815 = vmatpush3.bf16.msra.mxu1 %v2420_v17 }
   0xd   :  { %1802 = vmatprep.mubr.msk.bf16.mxu1 %vm130_vm0, %v2005_v14  ;;  %1816 = vmatprep.subr.bf16.mxu1 %v2433_v19 }
   0xe   :  { %1643 = vmatmul.mubr.msk.bf16.gmra.mrb[4].mxu0 %vm130_vm0, %v2001_v9 }
   0xf   :  { %207 = vmatprep.mubr.bf16.mxu0 %v2939_v2  ;;  %537 = vmatpush1.bf16.msra.mxu0 %v2383_v10 }
  0x10   :  { %538 = vmatprep.subr.bf16.mxu0 %v2389_v11  ;;  %1817 = vmatpush3.bf16.msra.mxu1 %v2433_v19 }
  0x11   :  { %1818 = vmatprep.subr.bf16.mxu1 %v2458_v23 }
  0x13   :  { %539 = vmatpush1.bf16.msra.mxu0 %v2397_v12  ;;  %1803 = vmatmul.mubr.msk.bf16.gmra.mrb[4].mxu1 %vm130_vm0, %v2009_v22 }
  0x14   :  { %540 = vmatprep.subr.bf16.mxu0 %v2403_v13  ;;  %1819 = vmatpush3.bf16.msra.mxu1 %v2458_v23 }
  0x15   :  { %1806 = vmatprep.mubr.msk.bf16.mxu1 %vm130_vm0, %v2013_v26  ;;  %1820 = vmatprep.subr.bf16.mxu1 %v2484_v28 }
  0x16   :  { %1644 = vmatmul.mubr.msk.bf16.gmra.mrb[8].mxu0 %vm130_vm0, %v2005_v14 }
  0x17   :  { %217 = vmatprep.mubr.bf16.mxu0 %v2939_v2  ;;  %541 = vmatpush1.bf16.msra.mxu0 %v2411_v15 }
  0x18   :  { %542 = vmatprep.subr.bf16.mxu0 %v2426_v18 }
  0x1b   :  { %543 = vmatpush1.bf16.msra.mxu0 %v2440_v20 }
  0x1c   :  { %544 = vmatprep.subr.bf16.mxu0 %v2446_v21 }
  0x1e   :  { %1645 = vmatmul.mubr.msk.bf16.gmra.mrb[12].mxu0 %vm130_vm0, %v2009_v22 }
  0x1f   :  { %227 = vmatprep.mubr.bf16.mxu0 %v2939_v2  ;;  %545 = vmatpush1.bf16.msra.mxu0 %v2464_v24 }
  0x20   :  { %546 = vmatprep.subr.bf16.mxu0 %v2470_v25 }
  0x23   :  { %547 = vmatpush1.bf16.msra.mxu0 %v2478_v27 }
  0x24   :  { %724 = vmatprep.subr.bf16.mxu0 %v2348_v4 }
  0x25   :  { %17 = vsyncpa [#allocation5], 0  ;;  %1821 = vmatpush3.bf16.msra.mxu1 %v2484_v28  ;;  %v2017_v30 = vld [vmem:[%s2928_s0 + $0x28] sm:$0xff]   ;;  %v2021_v32 = vld [vmem:[%s2928_s0 + $0x30] sm:$0xff]   ;;  %v59_v36 = vlaneseq  ;;  %s2274_s22 = smov 64   ;;  %s2275_s18 = smov 96  }
  0x26   :  { %1646 = vmatmul.mubr.msk.bf16.gmra.mrb[16].mxu0 %vm130_vm0, %v2013_v26  ;;  %1822 = vmatprep.subr.bf16.mxu1 %v2495_v29  ;;  %v2511_v31 = vld [vmem:[%s2930_s2 + $0x80] ss:$12 sps:$4 sm:$0xff]   ;;  %v2524_v33 = vld [vmem:[%s2930_s2 + $0x98] ss:$12 sps:$4 sm:$0xff]   ;;  %v2535_v35 = vld [vmem:[%s2930_s2 + $0xb0] ss:$12 sps:$4 sm:$0xff]  }
  0x27   :  { %237 = vmatprep.mubr.bf16.mxu0 %v2939_v2  ;;  %1807 = vmatmul.mubr.msk.bf16.gmra.mrb[8].mxu1 %vm130_vm0, %v2017_v30  ;;  %v2027_v34 = vld [vmem:[%s2928_s0 + $0x38] sm:$0xff]   ;;  %v60_v37 = vshrl.u32 %v59_v36, 7  ;;  %v57_v43 = vld [vmem:[%s2931_s3] sm:$0x7]  ;;  %vm1346_vm1 = vcmask 261120   ;;  %vm1351_vm2 = vcmask 523264  }
  0x28   :  { %1810 = vmatprep.mubr.msk.bf16.mxu1 %vm130_vm0, %v2021_v32  ;;  %vm1356_vm3 = vcmask 785408  }
  0x29   :  { %1823 = vmatpush3.bf16.msra.mxu1 %v2495_v29  ;;  %v69_v41 = vsub.s32 2, %v60_v37 }
  0x2a   :  { %1824 = vmatprep.subr.bf16.mxu1 %v2511_v31 }
  0x2b   :  { %v2596_v44 = vrot.slane %v57_v43, %v69_v41 }
  0x2d   :  { %1825 = vmatpush3.bf16.msra.mxu1 %v2511_v31 }
  0x2e   :  { %1647 = vmatmul.mubr.msk.bf16.gmra.mrb[20].mxu0 %vm130_vm0, %v2017_v30  ;;  %1826 = vmatprep.subr.bf16.mxu1 %v2524_v33 }
  0x2f   :  { %247 = vmatprep.mubr.bf16.mxu0 %v2939_v2  ;;  %1811 = vmatmul.mubr.msk.bf16.gmra.mrb[12].mxu1 %vm130_vm0, %v2027_v34 }
  0x30   :  { %1830 = vmatprep.mubr.bf16.mxu1 %v2939_v2 }
  0x31   :  { %1827 = vmatpush3.bf16.msra.mxu1 %v2524_v33 }
  0x32   :  { %1828 = vmatprep.subr.bf16.mxu1 %v2535_v35 }
  0x35   :  { %1829 = vmatpush3.bf16.msra.mxu1 %v2535_v35 }
  0x36   :  { %1648 = vmatmul.mubr.msk.bf16.gmra.mrb[24].mxu0 %vm130_vm0, %v2021_v32  ;;  %1834 = vmatprep.subr.bf16.mxu1 %v2420_v17  ;;  %v61_v32 = vsub.s32 0, %v60_v37 }
  0x37   :  { %257 = vmatprep.mubr.bf16.mxu0 %v2939_v2 }
  0x38   :  { %1831 = vmatmul.mubr.bf16.vlgmr.msra.gmra.mrb[16].mxu1 %v2939_v2  ;;  %v2638_v36 = vrot.slane %v57_v43, %v61_v32 }
  0x39   :  { %1835 = vmatpush3.bf16.msra.mxu1 %v2420_v17 }
  0x3a   :  { %1836 = vmatprep.subr.bf16.mxu1 %v2433_v19 }
  0x3d   :  { %1837 = vmatpush3.bf16.msra.mxu1 %v2433_v19 }
  0x3e   :  { %1649 = vmatmul.mubr.msk.bf16.gmra.mrb[28].mxu0 %vm130_vm0, %v2027_v34  ;;  %1838 = vmatprep.subr.bf16.mxu1 %v2458_v23  ;;  %v65_v34 = vsub.s32 1, %v60_v37 }
  0x3f   :  { %564 = vmatprep.mubr.bf16.mxu0 %v2939_v2 }
  0x41   :  { %1839 = vmatpush3.bf16.msra.mxu1 %v2458_v23 }
  0x42   :  { %1840 = vmatprep.subr.bf16.mxu1 %v2484_v28 }
  0x45   :  { %1841 = vmatpush3.bf16.msra.mxu1 %v2484_v28 }
  0x46   :  { %565 = vmatmul.mubr.bf16.vlgmr.msra.gmra.mrb[0].mxu0 %v2939_v2  ;;  %1842 = vmatprep.subr.bf16.mxu1 %v2495_v29 }
  0x47   :  { %574 = vmatprep.mubr.bf16.mxu0 %v2939_v2  ;;  %725 = vmatpush1.bf16.msra.mxu0 %v2353_v5 }
  0x48   :  { %726 = vmatprep.subr.bf16.mxu0 %v2360_v6 }
  0x49   :  { %1843 = vmatpush3.bf16.msra.mxu1 %v2495_v29 }
  0x4a   :  { %1844 = vmatprep.subr.bf16.mxu1 %v2511_v31 }
  0x4b   :  { %727 = vmatpush1.bf16.msra.mxu0 %v2368_v7 }
  0x4c   :  { %728 = vmatprep.subr.bf16.mxu0 %v2374_v8 }
  0x4d   :  { %1845 = vmatpush3.bf16.msra.mxu1 %v2511_v31 }
  0x4e   :  { %575 = vmatmul.mubr.bf16.gmra.mrb[4].mxu0 %v2939_v2  ;;  %1846 = vmatprep.subr.bf16.mxu1 %v2524_v33 }
  0x4f   :  { %729 = vmatpush1.bf16.msra.mxu0 %v2383_v10  ;;  %756 = vmatprep.mubr.bf16.mxu0 %v2939_v2 }
  0x50   :  { %730 = vmatprep.subr.bf16.mxu0 %v2389_v11 }
  0x51   :  { %1847 = vmatpush3.bf16.msra.mxu1 %v2524_v33 }
  0x52   :  { %1848 = vmatprep.subr.bf16.mxu1 %v2535_v35 }
  0x53   :  { %731 = vmatpush1.bf16.msra.mxu0 %v2397_v12 }
  0x54   :  { %732 = vmatprep.subr.bf16.mxu0 %v2403_v13 }
  0x55   :  { %1849 = vmatpush3.bf16.msra.mxu1 %v2535_v35 }
  0x56   :  { %1854 = vmatprep.subr.bf16.mxu1 %v2420_v17 }
  0x57   :  { %733 = vmatpush1.bf16.msra.mxu0 %v2411_v15 }
  0x58   :  { %734 = vmatprep.subr.bf16.mxu0 %v2426_v18 }
  0x5b   :  { %735 = vmatpush1.bf16.msra.mxu0 %v2440_v20 }
  0x5c   :  { %736 = vmatprep.subr.bf16.mxu0 %v2446_v21 }
  0x5f   :  { %737 = vmatpush1.bf16.msra.mxu0 %v2464_v24 }
  0x60   :  { %738 = vmatprep.subr.bf16.mxu0 %v2470_v25 }
  0x63   :  { %739 = vmatpush1.bf16.msra.mxu0 %v2478_v27 }
  0x64   :  { %916 = vmatprep.subr.bf16.mxu0 %v2348_v4 }
  0xde   :  { %v2585_v38 = vpop.f32.mrb[0].mxu1 }
  0xdf   :  { %v2587_v39 = vpop.f32.mrb[1].mxu1 }
  0xe0   :  { %v2589_v40 = vpop.f32.mrb[2].mxu1 }
  0xe1   :  { %v2591_v42 = vpop.f32.mrb[3].mxu1 }
  0xe6   :  { %v1804_v45 = vpop.f32.mrb[4].mxu1 }
  0xe7   :  { %v2599_v46 = vadd.f32 %v1804_v45, %v2596_v44  ;;  %v318_v47 = vpop.f32.mrb[5].mxu1  ;;  %v2640_v45 = vrot.slane %v57_v43, %v65_v34 }
  0xe8   :  { %v2602_v48 = vadd.f32 %v318_v47, %v2596_v44  ;;  %v1805_v49 = vpop.f32.mrb[6].mxu1 }
  0xe9   :  { %v2605_v50 = vadd.f32 %v1805_v49, %v2596_v44  ;;  %v321_v51 = vpop.f32.mrb[7].mxu1 }
  0xea   :  { %v2608_v52 = vadd.f32 %v321_v51, %v2596_v44 }
  0xfa   :  { %v1808_v53 = vpop.f32.mrb[8].mxu1 }
  0xfb   :  { %v2611_v54 = vadd.f32 %v1808_v53, %v2596_v44  ;;  %v334_v55 = vpop.f32.mrb[9].mxu1 }
  0xfc   :  { %v2614_v56 = vadd.f32 %v334_v55, %v2596_v44  ;;  %v1809_v57 = vpop.f32.mrb[10].mxu1 }
  0xfd   :  { %v2617_v58 = vadd.f32 %v1809_v57, %v2596_v44  ;;  %v337_v59 = vpop.f32.mrb[11].mxu1 }
  0xfe   :  { %v2620_v60 = vadd.f32 %v337_v59, %v2596_v44 }
 0x102   :  { %v1812_v61 = vpop.f32.mrb[12].mxu1 }
 0x103   :  { %v2623_v62 = vadd.f32 %v1812_v61, %v2596_v44  ;;  %v350_v63 = vpop.f32.mrb[13].mxu1 }
 0x104   :  { %v2626_v0 = vadd.f32 %v350_v63, %v2596_v44  ;;  %v1813_v1 = vpop.f32.mrb[14].mxu1 }
 0x105   :  { %v2629_v3 = vadd.f32 %v1813_v1, %v2596_v44  ;;  %v353_v9 = vpop.f32.mrb[15].mxu1 }
 0x106   :  { %v2632_v14 = vadd.f32 %v353_v9, %v2596_v44 }
 0x10b   :  { %v2634_v16 = vpop.f32.mrb[16].mxu1 }
 0x10c   :  { %v619_v22 = vpop.f32.mrb[17].mxu1 }
 0x10d   :  { %v2636_v26 = vpop.f32.mrb[18].mxu1 }
 0x10e   :  { %v622_v30 = vpop.f32.mrb[19].mxu1 }
 0x119   :  { %v566_v41 = vpop.f32.mrb[0].mxu0 }
 0x11a   :  { %v1922_v47 = vadd.f32 %v566_v41, %v2638_v36  ;;  %v568_v49 = vpop.f32.mrb[1].mxu0 }
 0x11b   :  { %v570_v51 = vpop.f32.mrb[2].mxu0  ;;  %v1923_v59 = vadd.f32 %v568_v49, %v2640_v45 }
 0x11c   :  { %v1683_v53 = vmul.f32 -1.442695, %v1922_v47  ;;  %v1924_v55 = vadd.f32 %v570_v51, %v2638_v36  ;;  %v572_v57 = vpop.f32.mrb[3].mxu0 }
 0x11d   :  { %v1925_v63 = vadd.f32 %v572_v57, %v2640_v45  ;;  %v1687_v37 = vmul.f32 -1.442695, %v1923_v59 }
 0x11e   :  { %2048 = vpow2.f32 %v1683_v53  ;;  %v1684_v61 = vmul.f32 -1.442695, %v1924_v55 }
 0x11f   :  { %v1688_v32 = vmul.f32 -1.442695, %v1925_v63 }
 0x120   :  { %2050 = vpow2.f32 %v1684_v61 }
 0x121   :  { %v576_v1 = vpop.f32.mrb[4].mxu0  ;;  %2052 = vpow2.f32 %v1687_v37  ;;  %v2653_v37 = vld [vmem:[%s2932_s4] ss:$0 sm:$0xff]  ;;  %s2273_s4 = smov 32  }
 0x122   :  { %v1926_v43 = vadd.f32 %v576_v1, %v2638_v36  ;;  %v578_v9 = vpop.f32.mrb[5].mxu0 }
 0x123   :  { %v580_v34 = vpop.f32.mrb[6].mxu0  ;;  %v1927_v47 = vadd.f32 %v578_v9, %v2640_v45 }
 0x124   :  { %v1685_v41 = vmul.f32 -1.442695, %v1926_v43  ;;  %v1928_v51 = vadd.f32 %v580_v34, %v2638_v36  ;;  %v582_v2 = vpop.f32.mrb[7].mxu0 }
 0x125   :  { %v1929_v53 = vadd.f32 %v582_v2, %v2640_v45  ;;  %v1689_v57 = vmul.f32 -1.442695, %v1927_v47  ;;  %v690_v47 = vadd.f32 %v2653_v37, %v619_v22 }
 0x126   :  { %2054 = vpow2.f32 %v1685_v41  ;;  %v1686_v49 = vmul.f32 -1.442695, %v1928_v51 }
 0x127   :  { %2056 = vpow2.f32 %v1688_v32  ;;  %v1690_v1 = vmul.f32 -1.442695, %v1929_v53 }
 0x128   :  { %v2049_v55 = vpop.eup %2048  ;;  %2058 = vpow2.f32 %v1686_v49 }
 0x129   :  { %v650_v59 = vadd.f32 1.0, %v2049_v55 }
 0x12a   :  { %v2051_v61 = vpop.eup %2050 }
 0x12b   :  { %2060 = vrcp.f32 %v650_v59  ;;  %v651_v63 = vadd.f32 1.0, %v2051_v61  ;;  %v2053_v43 = vpop.eup %2052  ;;  %v691_v61 = vadd.f32 %v2653_v37, %v622_v30  ;;  %v311_v30 = vadd.f32 %v2585_v38, %v2596_v44 }
 0x12c   :  { %2062 = vpow2.f32 %v1689_v57  ;;  %v678_v41 = vadd.f32 1.0, %v2053_v43  ;;  %v303_v57 = vadd.f32 %v2587_v39, %v2596_v44 }
 0x12d   :  { %2064 = vrcp.f32 %v651_v63 }
 0x12e   :  { %2066 = vpow2.f32 %v1690_v1  ;;  %v306_v1 = vadd.f32 %v2591_v42, %v2596_v44  ;;  %v693_v42 = vadd.f32 %v2636_v26, %v2653_v37 }
 0x130   :  { %v2055_v9 = vpop.eup %2054 }
 0x131   :  { %v2057_v32 = vpop.eup %2056  ;;  %v652_v2 = vadd.f32 1.0, %v2055_v9 }
 0x132   :  { %v2059_v34 = vpop.eup %2058  ;;  %v679_v49 = vadd.f32 1.0, %v2057_v32 }
 0x133   :  { %2068 = vrcp.f32 %v652_v2  ;;  %v653_v51 = vadd.f32 1.0, %v2059_v34 }
 0x135   :  { %v2061_v53 = vpop.eup %2060  ;;  %2070 = vrcp.f32 %v653_v51  ;;  %v692_v51 = vadd.f32 %v2634_v16, %v2653_v37 }
 0x136   :  { %v2063_v55 = vpop.eup %2062  ;;  %2072 = vrcp.f32 %v678_v41  ;;  %v694_v59 = vmul.f32 %v2061_v53, %v690_v47  ;;  %v314_v53 = vadd.f32 %v2589_v40, %v2596_v44 }
 0x137   :  { %v2065_v63 = vpop.eup %2064  ;;  %2074 = vrcp.f32 %v679_v49  ;;  %v680_v2 = vadd.f32 1.0, %v2063_v55 }
 0x138   :  { %v698_v43 = vadd.f32 %v694_v59, %v303_v57  ;;  %v695_v22 = vmul.f32 %v2065_v63, %v691_v61  ;;  %v2067_v9 = vpop.eup %2066 }
 0x139   :  { %v681_v34 = vadd.f32 1.0, %v2067_v9 }
 0x13a   :  { %2076 = vtanh.f32 %v698_v43  ;;  %v699_v32 = vadd.f32 %v695_v22, %v306_v1 }
 0x13c   :  { %2078 = vtanh.f32 %v699_v32 }
 0x13d   :  { %v2069_v39 = vpop.eup %2068  ;;  %2080 = vrcp.f32 %v680_v2 }
 0x13e   :  { %v696_v41 = vmul.f32 %v2069_v39, %v692_v51  ;;  %2082 = vrcp.f32 %v681_v34 }
 0x13f   :  { %v2071_v47 = vpop.eup %2070 }
 0x140   :  { %v2073_v49 = vpop.eup %2072  ;;  %v700_v55 = vadd.f32 %v696_v41, %v311_v30  ;;  %v697_v57 = vmul.f32 %v2071_v47, %v693_v42 }
 0x141   :  { %v2075_v59 = vpop.eup %2074  ;;  %v706_v61 = vsub.f32 1.0, %v2073_v49  ;;  %v714_v38 = vmul.f32 0.0, %v2073_v49  ;;  %v2941_v49 = vmov 0  }
 0x142   :  { %2084 = vtanh.f32 %v700_v55  ;;  %v701_v16 = vadd.f32 %v697_v57, %v314_v53  ;;  %v707_v1 = vsub.f32 1.0, %v2075_v59  ;;  %v715_v9 = vmul.f32 0.0, %v2075_v59 }
 0x144   :  { %v2077_v63 = vpop.eup %2076  ;;  %2086 = vtanh.f32 %v701_v16 }
 0x145   :  { %v710_v43 = vmul.f32 %v2077_v63, %v706_v61 }
 0x146   :  { %v2079_v22 = vpop.eup %2078 }
 0x147   :  { %v711_v26 = vmul.f32 %v2079_v22, %v707_v1  ;;  %v2669_v2 = vadd.f32 %v714_v38, %v710_v43  ;;  %v2081_v32 = vpop.eup %2080 }
 0x148   :  { %v2083_v40 = vpop.eup %2082  ;;  %v708_v34 = vsub.f32 1.0, %v2081_v32  ;;  %v716_v42 = vmul.f32 0.0, %v2081_v32 }
 0x149   :  { %v2671_v51 = vadd.f32 %v715_v9, %v711_v26  ;;  %v709_v30 = vsub.f32 1.0, %v2083_v40  ;;  %v717_v55 = vmul.f32 0.0, %v2083_v40 }
 0x14b   :  { %v722_v44 = vpack.c.bf16 %v2671_v51, %v2669_v2 }
 0x14c   :  { %v2085_v39 = vpop.eup %2084 }
 0x14d   :  { %757 = vmatmul.mubr.bf16.vlgmr.msra.gmra.mrb[8].mxu0 %v722_v44  ;;  %1850 = vmatprep.mubr.bf16.mxu1 %v722_v44  ;;  %v712_v41 = vmul.f32 %v2085_v39, %v708_v34 }
 0x14e   :  { %v2087_v47 = vpop.eup %2086  ;;  %766 = vmatprep.mubr.bf16.mxu0 %v2941_v49  ;;  %917 = vmatpush1.bf16.msra.mxu0 %v2353_v5 }
 0x14f   :  { %v713_v53 = vmul.f32 %v2087_v47, %v709_v30  ;;  %v2677_v57 = vadd.f32 %v716_v42, %v712_v41  ;;  %918 = vmatprep.subr.bf16.mxu0 %v2360_v6 }
 0x151   :  { %v2680_v59 = vadd.f32 %v717_v55, %v713_v53 }
 0x152   :  { %919 = vmatpush1.bf16.msra.mxu0 %v2368_v7 }
 0x153   :  { %v723_v16 = vpack.c.bf16 %v2680_v59, %v2677_v57  ;;  %920 = vmatprep.subr.bf16.mxu0 %v2374_v8 }
 0x155   :  { %767 = vmatmul.mubr.bf16.gmra.mrb[12].mxu0 %v723_v16  ;;  %1851 = vmatmul.mubr.bf16.vlgmr.msra.gmra.mrb[20].mxu1 %v723_v16 }
 0x156   :  { %921 = vmatpush1.bf16.msra.mxu0 %v2383_v10  ;;  %1855 = vmatpush3.bf16.msra.mxu1 %v2420_v17 }
 0x157   :  { %922 = vmatprep.subr.bf16.mxu0 %v2389_v11  ;;  %1856 = vmatprep.subr.bf16.mxu1 %v2433_v19 }
 0x158   :  { %948 = vmatprep.mubr.bf16.mxu0 %v2941_v49 }
 0x15a   :  { %923 = vmatpush1.bf16.msra.mxu0 %v2397_v12  ;;  %1857 = vmatpush3.bf16.msra.mxu1 %v2433_v19 }
 0x15b   :  { %924 = vmatprep.subr.bf16.mxu0 %v2403_v13  ;;  %1858 = vmatprep.subr.bf16.mxu1 %v2458_v23 }
 0x15e   :  { %925 = vmatpush1.bf16.msra.mxu0 %v2411_v15  ;;  %1859 = vmatpush3.bf16.msra.mxu1 %v2458_v23 }
 0x15f   :  { %926 = vmatprep.subr.bf16.mxu0 %v2426_v18  ;;  %1860 = vmatprep.subr.bf16.mxu1 %v2484_v28 }
 0x162   :  { %927 = vmatpush1.bf16.msra.mxu0 %v2440_v20  ;;  %1861 = vmatpush3.bf16.msra.mxu1 %v2484_v28 }
 0x163   :  { %928 = vmatprep.subr.bf16.mxu0 %v2446_v21  ;;  %1862 = vmatprep.subr.bf16.mxu1 %v2495_v29 }
 0x166   :  { %929 = vmatpush1.bf16.msra.mxu0 %v2464_v24  ;;  %1863 = vmatpush3.bf16.msra.mxu1 %v2495_v29 }
 0x167   :  { %930 = vmatprep.subr.bf16.mxu0 %v2470_v25  ;;  %1864 = vmatprep.subr.bf16.mxu1 %v2511_v31 }
 0x16a   :  { %931 = vmatpush1.bf16.msra.mxu0 %v2478_v27  ;;  %1865 = vmatpush3.bf16.msra.mxu1 %v2511_v31 }
 0x16b   :  { %1866 = vmatprep.subr.bf16.mxu1 %v2524_v33  ;;  %1108 = vmatprep.subr.bf16.mxu0 %v2348_v4 }
 0x16e   :  { %1867 = vmatpush3.bf16.msra.mxu1 %v2524_v33 }
 0x16f   :  { %1868 = vmatprep.subr.bf16.mxu1 %v2535_v35 }
 0x172   :  { %1869 = vmatpush3.bf16.msra.mxu1 %v2535_v35 }
 0x173   :  { %1874 = vmatprep.subr.bf16.mxu1 %v2420_v17 }
 0x220   :  { %v758_v61 = vpop.f32.mrb[8].mxu0 }
 0x221   :  { %v1930_v63 = vadd.f32 %v758_v61, %v2638_v36  ;;  %v760_v38 = vpop.f32.mrb[9].mxu0 }
 0x222   :  { %v762_v1 = vpop.f32.mrb[10].mxu0  ;;  %v1931_v26 = vadd.f32 %v760_v38, %v2640_v45 }
 0x223   :  { %v1691_v43 = vmul.f32 -1.442695, %v1930_v63  ;;  %v1932_v22 = vadd.f32 %v762_v1, %v2638_v36  ;;  %v764_v9 = vpop.f32.mrb[11].mxu0 }
 0x224   :  { %v1933_v32 = vadd.f32 %v764_v9, %v2640_v45  ;;  %v1695_v40 = vmul.f32 -1.442695, %v1931_v26 }
 0x225   :  { %2088 = vpow2.f32 %v1691_v43  ;;  %v1692_v4 = vmul.f32 -1.442695, %v1932_v22 }
 0x226   :  { %v1696_v42 = vmul.f32 -1.442695, %v1933_v32 }
 0x227   :  { %2090 = vpow2.f32 %v1692_v4 }
 0x228   :  { %v768_v44 = vpop.f32.mrb[12].mxu0  ;;  %v1852_v34 = vpop.f32.mrb[20].mxu1  ;;  %2092 = vpow2.f32 %v1695_v40 }
 0x229   :  { %v1934_v39 = vadd.f32 %v768_v44, %v2638_v36  ;;  %v770_v30 = vpop.f32.mrb[13].mxu0  ;;  %v811_v41 = vpop.f32.mrb[21].mxu1 }
 0x22a   :  { %v772_v47 = vpop.f32.mrb[14].mxu0  ;;  %v1853_v53 = vpop.f32.mrb[22].mxu1  ;;  %v1935_v16 = vadd.f32 %v770_v30, %v2640_v45 }
 0x22b   :  { %v1693_v55 = vmul.f32 -1.442695, %v1934_v39  ;;  %v1936_v61 = vadd.f32 %v772_v47, %v2638_v36  ;;  %v774_v63 = vpop.f32.mrb[15].mxu0  ;;  %v814_v38 = vpop.f32.mrb[23].mxu1 }
 0x22c   :  { %v1937_v43 = vadd.f32 %v774_v63, %v2640_v45  ;;  %v1697_v9 = vmul.f32 -1.442695, %v1935_v16  ;;  %v882_v16 = vadd.f32 %v2653_v37, %v811_v41 }
 0x22d   :  { %2094 = vpow2.f32 %v1693_v55  ;;  %v1694_v1 = vmul.f32 -1.442695, %v1936_v61 }
 0x22e   :  { %2096 = vpow2.f32 %v1696_v42  ;;  %v1698_v44 = vmul.f32 -1.442695, %v1937_v43  ;;  %v883_v43 = vadd.f32 %v2653_v37, %v814_v38 }
 0x22f   :  { %v2089_v22 = vpop.eup %2088  ;;  %2098 = vpow2.f32 %v1694_v1 }
 0x230   :  { %v842_v26 = vadd.f32 1.0, %v2089_v22 }
 0x231   :  { %v2091_v4 = vpop.eup %2090 }
 0x232   :  { %2100 = vrcp.f32 %v842_v26  ;;  %v843_v32 = vadd.f32 1.0, %v2091_v4  ;;  %v2093_v39 = vpop.eup %2092 }
 0x233   :  { %2102 = vpow2.f32 %v1697_v9  ;;  %v870_v61 = vadd.f32 1.0, %v2093_v39 }
 0x234   :  { %2104 = vrcp.f32 %v843_v32 }
 0x235   :  { %2106 = vpow2.f32 %v1698_v44 }
 0x237   :  { %v2095_v30 = vpop.eup %2094 }
 0x238   :  { %v2097_v47 = vpop.eup %2096  ;;  %v844_v40 = vadd.f32 1.0, %v2095_v30 }
 0x239   :  { %v2099_v55 = vpop.eup %2098  ;;  %v871_v63 = vadd.f32 1.0, %v2097_v47  ;;  %v884_v47 = vadd.f32 %v1852_v34, %v2653_v37 }
 0x23a   :  { %2108 = vrcp.f32 %v844_v40  ;;  %v845_v42 = vadd.f32 1.0, %v2099_v55 }
 0x23c   :  { %v2101_v1 = vpop.eup %2100  ;;  %2110 = vrcp.f32 %v845_v42 }
 0x23d   :  { %v2103_v22 = vpop.eup %2102  ;;  %2112 = vrcp.f32 %v870_v61  ;;  %v886_v26 = vmul.f32 %v2101_v1, %v882_v16  ;;  %v885_v61 = vadd.f32 %v1853_v53, %v2653_v37 }
 0x23e   :  { %v2105_v9 = vpop.eup %2104  ;;  %2114 = vrcp.f32 %v871_v63  ;;  %v872_v30 = vadd.f32 1.0, %v2103_v22 }
 0x23f   :  { %v890_v4 = vadd.f32 %v886_v26, %v2602_v48  ;;  %v887_v32 = vmul.f32 %v2105_v9, %v883_v43  ;;  %v2107_v44 = vpop.eup %2106 }
 0x240   :  { %v873_v41 = vadd.f32 1.0, %v2107_v44 }
 0x241   :  { %2116 = vtanh.f32 %v890_v4  ;;  %v891_v39 = vadd.f32 %v887_v32, %v2608_v52 }
 0x243   :  { %2118 = vtanh.f32 %v891_v39 }
 0x244   :  { %v2109_v40 = vpop.eup %2108  ;;  %2120 = vrcp.f32 %v872_v30 }
 0x245   :  { %v888_v55 = vmul.f32 %v2109_v40, %v884_v47  ;;  %2122 = vrcp.f32 %v873_v41 }
 0x246   :  { %v2111_v38 = vpop.eup %2110 }
 0x247   :  { %v2113_v42 = vpop.eup %2112  ;;  %v892_v63 = vadd.f32 %v888_v55, %v2599_v46  ;;  %v889_v48 = vmul.f32 %v2111_v38, %v885_v61 }
 0x248   :  { %v2115_v16 = vpop.eup %2114  ;;  %v898_v52 = vsub.f32 1.0, %v2113_v42  ;;  %v906_v26 = vmul.f32 %v2113_v42, %v2669_v2 }
 0x249   :  { %2124 = vtanh.f32 %v892_v63  ;;  %v893_v1 = vadd.f32 %v889_v48, %v2605_v50  ;;  %v899_v43 = vsub.f32 1.0, %v2115_v16  ;;  %v907_v32 = vmul.f32 %v2115_v16, %v2671_v51 }
 0x24b   :  { %v2117_v22 = vpop.eup %2116  ;;  %2126 = vtanh.f32 %v893_v1 }
 0x24c   :  { %v902_v34 = vmul.f32 %v2117_v22, %v898_v52 }
 0x24d   :  { %v2119_v9 = vpop.eup %2118 }
 0x24e   :  { %v2732_v4 = vadd.f32 %v906_v26, %v902_v34  ;;  %v903_v53 = vmul.f32 %v2119_v9, %v899_v43  ;;  %v2121_v46 = vpop.eup %2120 }
 0x24f   :  { %v2123_v50 = vpop.eup %2122  ;;  %v900_v39 = vsub.f32 1.0, %v2121_v46  ;;  %v908_v40 = vmul.f32 %v2121_v46, %v2677_v57 }
 0x250   :  { %1302 = vrot.lane.b32.xlu0 %v2732_v4, %s2273_s4  ;;  %v2736_v44 = vadd.f32 %v907_v32, %v903_v53  ;;  %v901_v55 = vsub.f32 1.0, %v2123_v50  ;;  %v909_v63 = vmul.f32 %v2123_v50, %v2680_v59 }
 0x252   :  { %v914_v30 = vpack.c.bf16 %v2736_v44, %v2732_v4 }
 0x253   :  { %v2125_v47 = vpop.eup %2124 }
 0x254   :  { %1304 = vrot.lane.b32.xlu0 %v2736_v44, %s2273_s4  ;;  %949 = vmatmul.mubr.bf16.vlgmr.msra.gmra.mrb[16].mxu0 %v914_v30  ;;  %v904_v41 = vmul.f32 %v2125_v47, %v900_v39 }
 0x255   :  { %v2127_v61 = vpop.eup %2126  ;;  %1870 = vmatprep.mubr.bf16.mxu1 %v914_v30  ;;  %958 = vmatprep.mubr.bf16.mxu0 %v2941_v49 }
 0x256   :  { %v2743_v38 = vadd.f32 %v908_v40, %v904_v41  ;;  %v905_v42 = vmul.f32 %v2127_v61, %v901_v55  ;;  %1109 = vmatpush1.bf16.msra.mxu0 %v2353_v5 }
 0x257   :  { %1110 = vmatprep.subr.bf16.mxu0 %v2360_v6 }
 0x258   :  { %1306 = vrot.lane.b32.xlu1 %v2743_v38, %s2273_s4  ;;  %v2749_v48 = vadd.f32 %v909_v63, %v905_v42 }
 0x25a   :  { %v915_v16 = vpack.c.bf16 %v2749_v48, %v2743_v38  ;;  %1111 = vmatpush1.bf16.msra.mxu0 %v2368_v7 }
 0x25b   :  { %1112 = vmatprep.subr.bf16.mxu0 %v2374_v8 }
 0x25c   :  { %1308 = vrot.lane.b32.xlu1 %v2749_v48, %s2273_s4  ;;  %959 = vmatmul.mubr.bf16.gmra.mrb[20].mxu0 %v915_v16 }
 0x25d   :  { %1871 = vmatmul.mubr.bf16.vlgmr.msra.gmra.mrb[24].mxu1 %v915_v16  ;;  %1140 = vmatprep.mubr.bf16.mxu0 %v2941_v49 }
 0x25e   :  { %1113 = vmatpush1.bf16.msra.mxu0 %v2383_v10  ;;  %1875 = vmatpush3.bf16.msra.mxu1 %v2420_v17 }
 0x25f   :  { %1114 = vmatprep.subr.bf16.mxu0 %v2389_v11  ;;  %1876 = vmatprep.subr.bf16.mxu1 %v2433_v19 }
 0x262   :  { %1115 = vmatpush1.bf16.msra.mxu0 %v2397_v12  ;;  %1877 = vmatpush3.bf16.msra.mxu1 %v2433_v19 }
 0x263   :  { %1116 = vmatprep.subr.bf16.mxu0 %v2403_v13  ;;  %1878 = vmatprep.subr.bf16.mxu1 %v2458_v23 }
 0x266   :  { %1117 = vmatpush1.bf16.msra.mxu0 %v2411_v15  ;;  %1879 = vmatpush3.bf16.msra.mxu1 %v2458_v23 }
 0x267   :  { %1118 = vmatprep.subr.bf16.mxu0 %v2426_v18  ;;  %1880 = vmatprep.subr.bf16.mxu1 %v2484_v28 }
 0x26a   :  { %1119 = vmatpush1.bf16.msra.mxu0 %v2440_v20  ;;  %1881 = vmatpush3.bf16.msra.mxu1 %v2484_v28 }
 0x26b   :  { %1120 = vmatprep.subr.bf16.mxu0 %v2446_v21  ;;  %1882 = vmatprep.subr.bf16.mxu1 %v2495_v29 }
 0x26e   :  { %1121 = vmatpush1.bf16.msra.mxu0 %v2464_v24  ;;  %1883 = vmatpush3.bf16.msra.mxu1 %v2495_v29 }
 0x26f   :  { %1122 = vmatprep.subr.bf16.mxu0 %v2470_v25  ;;  %1884 = vmatprep.subr.bf16.mxu1 %v2511_v31 }
 0x272   :  { %1123 = vmatpush1.bf16.msra.mxu0 %v2478_v27  ;;  %1885 = vmatpush3.bf16.msra.mxu1 %v2511_v31 }
 0x273   :  { %1886 = vmatprep.subr.bf16.mxu1 %v2524_v33 }
 0x276   :  { %1887 = vmatpush3.bf16.msra.mxu1 %v2524_v33 }
 0x277   :  { %1888 = vmatprep.subr.bf16.mxu1 %v2535_v35 }
 0x27a   :  { %1889 = vmatpush3.bf16.msra.mxu1 %v2535_v35 }
 0x327   :  { %v950_v5 = vpop.f32.mrb[16].mxu0 }
 0x328   :  { %v1938_v6 = vadd.f32 %v950_v5, %v2638_v36  ;;  %v952_v7 = vpop.f32.mrb[17].mxu0 }
 0x329   :  { %v954_v8 = vpop.f32.mrb[18].mxu0  ;;  %v1939_v13 = vadd.f32 %v952_v7, %v2640_v45 }
 0x32a   :  { %v1699_v10 = vmul.f32 -1.442695, %v1938_v6  ;;  %v1940_v11 = vadd.f32 %v954_v8, %v2638_v36  ;;  %v956_v12 = vpop.f32.mrb[19].mxu0 }
 0x32b   :  { %v1941_v17 = vadd.f32 %v956_v12, %v2640_v45  ;;  %v1703_v18 = vmul.f32 -1.442695, %v1939_v13 }
 0x32c   :  { %2128 = vpow2.f32 %v1699_v10  ;;  %v1700_v15 = vmul.f32 -1.442695, %v1940_v11 }
 0x32d   :  { %v1704_v24 = vmul.f32 -1.442695, %v1941_v17 }
 0x32e   :  { %2130 = vpow2.f32 %v1700_v15 }
 0x32f   :  { %v960_v19 = vpop.f32.mrb[20].mxu0  ;;  %2132 = vpow2.f32 %v1703_v18 }
 0x330   :  { %v1942_v20 = vadd.f32 %v960_v19, %v2638_v36  ;;  %v1872_v21 = vpop.f32.mrb[24].mxu1  ;;  %v962_v23 = vpop.f32.mrb[21].mxu0 }
 0x331   :  { %v1003_v25 = vpop.f32.mrb[25].mxu1  ;;  %v964_v27 = vpop.f32.mrb[22].mxu0  ;;  %v1943_v29 = vadd.f32 %v962_v23, %v2640_v45  ;;  %v1076_v13 = vadd.f32 %v1872_v21, %v2653_v37 }
 0x332   :  { %v1701_v28 = vmul.f32 -1.442695, %v1942_v20  ;;  %v1944_v31 = vadd.f32 %v964_v27, %v2638_v36  ;;  %v1873_v33 = vpop.f32.mrb[26].mxu1  ;;  %v966_v35 = vpop.f32.mrb[23].mxu0  ;;  %v1074_v61 = vadd.f32 %v2653_v37, %v1003_v25 }
 0x333   :  { %v1006_v1 = vpop.f32.mrb[27].mxu1  ;;  %v1945_v22 = vadd.f32 %v966_v35, %v2640_v45  ;;  %v1705_v26 = vmul.f32 -1.442695, %v1943_v29  ;;  %v1077_v19 = vadd.f32 %v1873_v33, %v2653_v37 }
 0x334   :  { %2134 = vpow2.f32 %v1701_v28  ;;  %v1702_v52 = vmul.f32 -1.442695, %v1944_v31  ;;  %v1075_v5 = vadd.f32 %v2653_v37, %v1006_v1 }
 0x335   :  { %2136 = vpow2.f32 %v1704_v24  ;;  %v1706_v32 = vmul.f32 -1.442695, %v1945_v22 }
 0x336   :  { %v2129_v34 = vpop.eup %2128  ;;  %2138 = vpow2.f32 %v1702_v52 }
 0x337   :  { %v1034_v43 = vadd.f32 1.0, %v2129_v34 }
 0x338   :  { %v2131_v9 = vpop.eup %2130 }
 0x339   :  { %2140 = vrcp.f32 %v1034_v43  ;;  %v1035_v53 = vadd.f32 1.0, %v2131_v9  ;;  %v2133_v46 = vpop.eup %2132 }
 0x33a   :  { %2142 = vpow2.f32 %v1705_v26  ;;  %v1062_v41 = vadd.f32 1.0, %v2133_v46 }
 0x33b   :  { %2144 = vrcp.f32 %v1035_v53 }
 0x33c   :  { %2146 = vpow2.f32 %v1706_v32 }
 0x33e   :  { %v2135_v50 = vpop.eup %2134 }
 0x33f   :  { %v2137_v30 = vpop.eup %2136  ;;  %v1036_v39 = vadd.f32 1.0, %v2135_v50 }
 0x340   :  { %v2139_v47 = vpop.eup %2138  ;;  %v1063_v55 = vadd.f32 1.0, %v2137_v30 }
 0x341   :  { %2148 = vrcp.f32 %v1036_v39  ;;  %v1037_v40 = vadd.f32 1.0, %v2139_v47  ;;  %v2041_v47 = vld [vmem:[%s2933_s5 + $0x18] sm:$0xff]  }
 0x343   :  { %v2141_v42 = vpop.eup %2140  ;;  %2150 = vrcp.f32 %v1037_v40 }
 0x344   :  { %v2143_v63 = vpop.eup %2142  ;;  %2152 = vrcp.f32 %v1062_v41  ;;  %v1078_v16 = vmul.f32 %v2141_v42, %v1074_v61  ;;  %v2042_v41 = vld [vmem:[%s2933_s5 + $0x20] sm:$0xff]  }
 0x345   :  { %v2145_v6 = vpop.eup %2144  ;;  %2154 = vrcp.f32 %v1063_v55  ;;  %v1064_v11 = vadd.f32 1.0, %v2143_v63 }
 0x346   :  { %v1082_v7 = vadd.f32 %v1078_v16, %v2614_v56  ;;  %v1079_v8 = vmul.f32 %v2145_v6, %v1075_v5  ;;  %v2147_v10 = vpop.eup %2146 }
 0x347   :  { %v1065_v15 = vadd.f32 1.0, %v2147_v10 }
 0x348   :  { %2156 = vtanh.f32 %v1082_v7  ;;  %v1083_v12 = vadd.f32 %v1079_v8, %v2620_v60 }
 0x34a   :  { %2158 = vtanh.f32 %v1083_v12 }
 0x34b   :  { %v2149_v17 = vpop.eup %2148  ;;  %2160 = vrcp.f32 %v1064_v11 }
 0x34c   :  { %v1080_v18 = vmul.f32 %v2149_v17, %v1076_v13  ;;  %2162 = vrcp.f32 %v1065_v15 }
 0x34d   :  { %v2151_v20 = vpop.eup %2150 }
 0x34e   :  { %v2153_v23 = vpop.eup %2152  ;;  %v1084_v24 = vadd.f32 %v1080_v18, %v2611_v54  ;;  %v1081_v56 = vmul.f32 %v2151_v20, %v1077_v19 }
 0x34f   :  { %v2155_v25 = vpop.eup %2154  ;;  %v1090_v60 = vsub.f32 1.0, %v2153_v23  ;;  %v1098_v29 = vmul.f32 %v2153_v23, %v2732_v4 }
 0x350   :  { %2164 = vtanh.f32 %v1084_v24  ;;  %v1085_v27 = vadd.f32 %v1081_v56, %v2617_v58  ;;  %v1091_v31 = vsub.f32 1.0, %v2155_v25  ;;  %v1099_v52 = vmul.f32 %v2155_v25, %v2736_v44 }
 0x352   :  { %v2157_v28 = vpop.eup %2156  ;;  %2166 = vtanh.f32 %v1085_v27 }
 0x353   :  { %v1094_v21 = vmul.f32 %v2157_v28, %v1090_v60 }
 0x354   :  { %v2159_v35 = vpop.eup %2158 }
 0x355   :  { %v2800_v1 = vadd.f32 %v1098_v29, %v1094_v21  ;;  %v1095_v33 = vmul.f32 %v2159_v35, %v1091_v31  ;;  %v2161_v54 = vpop.eup %2160 }
 0x356   :  { %v2163_v58 = vpop.eup %2162  ;;  %v1092_v4 = vsub.f32 1.0, %v2161_v54  ;;  %v1100_v9 = vmul.f32 %v2161_v54, %v2743_v38  ;;  %v2039_v38 = vld [vmem:[%s2933_s5 + $0x8] sm:$0xff]  }
 0x357   :  { %1318 = vrot.lane.b32.xlu0 %v2800_v1, %s2274_s22  ;;  %v2804_v22 = vadd.f32 %v1099_v52, %v1095_v33  ;;  %v1093_v44 = vsub.f32 1.0, %v2163_v58  ;;  %v1101_v50 = vmul.f32 %v2163_v58, %v2749_v48  ;;  %v2040_v48 = vld [vmem:[%s2933_s5 + $0x10] sm:$0xff]  }
 0x359   :  { %1320 = vrot.lane.b32.xlu1 %v2804_v22, %s2274_s22  ;;  %v1106_v34 = vpack.c.bf16 %v2804_v22, %v2800_v1 }
 0x35a   :  { %v2165_v26 = vpop.eup %2164 }
 0x35b   :  { %1141 = vmatmul.mubr.bf16.vlgmr.msra.gmra.mrb[24].mxu0 %v1106_v34  ;;  %1890 = vmatprep.mubr.bf16.mxu1 %v1106_v34  ;;  %v1096_v43 = vmul.f32 %v2165_v26, %v1092_v4 }
 0x35c   :  { %v2167_v53 = vpop.eup %2166  ;;  %1150 = vmatprep.mubr.bf16.mxu0 %v2941_v49  ;;  %v2038_v49 = vld [vmem:[%s2933_s5] sm:$0xff]  }
 0x35d   :  { %v2811_v32 = vadd.f32 %v1100_v9, %v1096_v43  ;;  %v1097_v46 = vmul.f32 %v2167_v53, %v1093_v44  ;;  %1894 = vmatprep.subr.bf16.mxu1 %v2038_v49 }
 0x35f   :  { %1322 = vrot.lane.b32.xlu0 %v2811_v32, %s2274_s22  ;;  %v2815_v30 = vadd.f32 %v1101_v50, %v1097_v46 }
 0x361   :  { %1324 = vrot.lane.b32.xlu1 %v2815_v30, %s2274_s22  ;;  %v1107_v39 = vpack.c.bf16 %v2815_v30, %v2811_v32 }
 0x363   :  { %1151 = vmatmul.mubr.bf16.gmra.mrb[28].mxu0 %v1107_v39  ;;  %1891 = vmatmul.mubr.bf16.vlgmr.msra.gmra.mrb[28].mxu1 %v1107_v39 }
 0x364   :  { %1895 = vmatpush3.bf16.msra.mxu1 %v2038_v49 }
 0x365   :  { %1896 = vmatprep.subr.bf16.mxu1 %v2039_v38 }
 0x368   :  { %1897 = vmatpush3.bf16.msra.mxu1 %v2039_v38 }
 0x369   :  { %1898 = vmatprep.subr.bf16.mxu1 %v2040_v48 }
 0x36c   :  { %1899 = vmatpush3.bf16.msra.mxu1 %v2040_v48 }
 0x36d   :  { %1900 = vmatprep.subr.bf16.mxu1 %v2041_v47 }
 0x370   :  { %1901 = vmatpush3.bf16.msra.mxu1 %v2041_v47 }
 0x371   :  { %1902 = vmatprep.subr.bf16.mxu1 %v2042_v41 }
 0x374   :  { %1903 = vmatpush3.bf16.msra.mxu1 %v2042_v41 }
 0x42e   :  { %v1142_v40 = vpop.f32.mrb[24].mxu0 }
 0x42f   :  { %v1946_v55 = vadd.f32 %v1142_v40, %v2638_v36  ;;  %v1144_v61 = vpop.f32.mrb[25].mxu0 }
 0x430   :  { %v1146_v42 = vpop.f32.mrb[26].mxu0  ;;  %v1947_v6 = vadd.f32 %v1144_v61, %v2640_v45  ;;  %v2043_v61 = vld [vmem:[%s2933_s5 + $0x28] sm:$0xff]  }
 0x431   :  { %v1707_v63 = vmul.f32 -1.442695, %v1946_v55  ;;  %v1948_v16 = vadd.f32 %v1146_v42, %v2638_v36  ;;  %v1148_v5 = vpop.f32.mrb[27].mxu0  ;;  %1904 = vmatprep.subr.bf16.mxu1 %v2043_v61 }
 0x432   :  { %v1949_v8 = vadd.f32 %v1148_v5, %v2640_v45  ;;  %v1711_v10 = vmul.f32 -1.442695, %v1947_v6  ;;  %1905 = vmatpush3.bf16.msra.mxu1 %v2043_v61 }
 0x433   :  { %2168 = vpow2.f32 %v1707_v63  ;;  %v1708_v7 = vmul.f32 -1.442695, %v1948_v16 }
 0x434   :  { %v1712_v18 = vmul.f32 -1.442695, %v1949_v8 }
 0x435   :  { %2170 = vpow2.f32 %v1708_v7 }
 0x436   :  { %v1152_v11 = vpop.f32.mrb[28].mxu0  ;;  %v1892_v12 = vpop.f32.mrb[28].mxu1  ;;  %2172 = vpow2.f32 %v1711_v10 }
 0x437   :  { %v1950_v13 = vadd.f32 %v1152_v11, %v2638_v36  ;;  %v1154_v15 = vpop.f32.mrb[29].mxu0  ;;  %v1195_v17 = vpop.f32.mrb[29].mxu1  ;;  %v1268_v40 = vadd.f32 %v1892_v12, %v2653_v37  ;;  %v2045_v12 = vld [vmem:[%s2933_s5 + $0x38] sm:$0xff]  }
 0x438   :  { %v1156_v19 = vpop.f32.mrb[30].mxu0  ;;  %v1893_v20 = vpop.f32.mrb[30].mxu1  ;;  %v1951_v24 = vadd.f32 %v1154_v15, %v2640_v45  ;;  %v1266_v9 = vadd.f32 %v2653_v37, %v1195_v17 }
 0x439   :  { %v1709_v23 = vmul.f32 -1.442695, %v1950_v13  ;;  %v1952_v56 = vadd.f32 %v1156_v19, %v2638_v36  ;;  %v1158_v25 = vpop.f32.mrb[31].mxu0  ;;  %v1198_v27 = vpop.f32.mrb[31].mxu1  ;;  %v1269_v16 = vadd.f32 %v1893_v20, %v2653_v37 }
 0x43a   :  { %v1953_v28 = vadd.f32 %v1158_v25, %v2640_v45  ;;  %v1713_v29 = vmul.f32 -1.442695, %v1951_v24  ;;  %v1267_v50 = vadd.f32 %v2653_v37, %v1198_v27 }
 0x43b   :  { %2174 = vpow2.f32 %v1709_v23  ;;  %v1710_v60 = vmul.f32 -1.442695, %v1952_v56 }
 0x43c   :  { %2176 = vpow2.f32 %v1712_v18  ;;  %v1714_v52 = vmul.f32 -1.442695, %v1953_v28 }
 0x43d   :  { %v2169_v21 = vpop.eup %2168  ;;  %2178 = vpow2.f32 %v1710_v60 }
 0x43e   :  { %v1226_v31 = vadd.f32 1.0, %v2169_v21 }
 0x43f   :  { %v2171_v35 = vpop.eup %2170 }
 0x440   :  { %2180 = vrcp.f32 %v1226_v31  ;;  %v1227_v33 = vadd.f32 1.0, %v2171_v35  ;;  %v2173_v54 = vpop.eup %2172  ;;  %v1303_v35 = vpop.permute.xlu0 %1302 }
 0x441   :  { %2182 = vpow2.f32 %v1713_v29  ;;  %v1254_v26 = vadd.f32 1.0, %v2173_v54 }
 0x442   :  { %2184 = vrcp.f32 %v1227_v33  ;;  %v1307_v33 = vpop.permute.xlu1 %1306 }
 0x443   :  { %2186 = vpow2.f32 %v1714_v52 }
 0x444   :  { %v1305_v52 = vpop.permute.xlu0 %1304 }
 0x445   :  { %v2175_v36 = vpop.eup %2174 }
 0x446   :  { %v2177_v58 = vpop.eup %2176  ;;  %v1228_v34 = vadd.f32 1.0, %v2175_v36  ;;  %v1309_v54 = vpop.permute.xlu1 %1308 }
 0x447   :  { %v2179_v4 = vpop.eup %2178  ;;  %v1255_v45 = vadd.f32 1.0, %v2177_v58 }
 0x448   :  { %2188 = vrcp.f32 %v1228_v34  ;;  %v1229_v43 = vadd.f32 1.0, %v2179_v4  ;;  %v1319_v36 = vpop.permute.xlu0 %1318 }
 0x44a   :  { %v2181_v44 = vpop.eup %2180  ;;  %2190 = vrcp.f32 %v1229_v43  ;;  %v1321_v58 = vpop.permute.xlu1 %1320  ;;  %v1348_v43 = vsel %vm1346_vm1, %v2671_v51, %v1305_v52  ;;  %v1350_v51 = vsel %vm1346_vm1, %v2680_v59, %v1309_v54  ;;  %v2047_v59 = vld [vmem:[%s2935_s7 + $0x8] sm:$0xff]  }
 0x44b   :  { %v2183_v53 = vpop.eup %2182  ;;  %2192 = vrcp.f32 %v1254_v26  ;;  %v1270_v46 = vmul.f32 %v2181_v44, %v1266_v9  ;;  %v1353_v9 = vsel %vm1351_vm2, %v1348_v43, %v1321_v58 }
 0x44c   :  { %v2185_v39 = vpop.eup %2184  ;;  %2194 = vrcp.f32 %v1255_v45  ;;  %v1256_v47 = vadd.f32 1.0, %v2183_v53  ;;  %v1323_v34 = vpop.permute.xlu0 %1322 }
 0x44d   :  { %v1274_v49 = vadd.f32 %v1270_v46, %v2626_v0  ;;  %v1271_v38 = vmul.f32 %v2185_v39, %v1267_v50  ;;  %v2187_v48 = vpop.eup %2186 }
 0x44e   :  { %v1257_v55 = vadd.f32 1.0, %v2187_v48  ;;  %v1325_v4 = vpop.permute.xlu1 %1324 }
 0x44f   :  { %2196 = vtanh.f32 %v1274_v49  ;;  %v1275_v41 = vadd.f32 %v1271_v38, %v2632_v14  ;;  %v2044_v14 = vld [vmem:[%s2933_s5 + $0x30] sm:$0xff]   ;;  %v1355_v38 = vsel %vm1351_vm2, %v1350_v51, %v1325_v4 }
 0x450   :  { %1906 = vmatprep.subr.bf16.mxu1 %v2044_v14 }
 0x451   :  { %2198 = vtanh.f32 %v1275_v41  ;;  %1907 = vmatpush3.bf16.msra.mxu1 %v2044_v14 }
 0x452   :  { %v2189_v42 = vpop.eup %2188  ;;  %2200 = vrcp.f32 %v1256_v47  ;;  %1908 = vmatprep.subr.bf16.mxu1 %v2045_v12 }
 0x453   :  { %v1272_v63 = vmul.f32 %v2189_v42, %v1268_v40  ;;  %2202 = vrcp.f32 %v1257_v55  ;;  %v1715_v40 = vld [vmem:[%s2934_s6] ss:$0 sm:$0xff] }
 0x454   :  { %v2191_v0 = vpop.eup %2190 }
 0x455   :  { %v2193_v5 = vpop.eup %2192  ;;  %v1276_v6 = vadd.f32 %v1272_v63, %v2623_v62  ;;  %v1273_v7 = vmul.f32 %v2191_v0, %v1269_v16  ;;  %1909 = vmatpush3.bf16.msra.mxu1 %v2045_v12 }
 0x456   :  { %v2195_v8 = vpop.eup %2194  ;;  %v1282_v11 = vsub.f32 1.0, %v2193_v5  ;;  %v1290_v15 = vmul.f32 %v2193_v5, %v2800_v1 }
 0x457   :  { %2204 = vtanh.f32 %v1276_v6  ;;  %v1277_v10 = vadd.f32 %v1273_v7, %v2629_v3  ;;  %v1283_v17 = vsub.f32 1.0, %v2195_v8  ;;  %v1291_v20 = vmul.f32 %v2195_v8, %v2804_v22 }
 0x459   :  { %v2197_v37 = vpop.eup %2196  ;;  %2206 = vtanh.f32 %v1277_v10 }
 0x45a   :  { %v1286_v13 = vmul.f32 %v2197_v37, %v1282_v11 }
 0x45b   :  { %v2199_v62 = vpop.eup %2198 }
 0x45c   :  { %v1294_v18 = vadd.f32 %v1290_v15, %v1286_v13  ;;  %v1287_v19 = vmul.f32 %v2199_v62, %v1283_v17  ;;  %v2201_v3 = vpop.eup %2200 }
 0x45d   :  { %v2203_v24 = vpop.eup %2202  ;;  %v1284_v56 = vsub.f32 1.0, %v2201_v3  ;;  %v1292_v60 = vmul.f32 %v2201_v3, %v2811_v32  ;;  %v1347_v32 = vsel %vm1346_vm1, %v2669_v2, %v1303_v35  ;;  %v1349_v2 = vsel %vm1346_vm1, %v2677_v57, %v1307_v33  ;;  %v2046_v57 = vld [vmem:[%s2935_s7] sm:$0xff]   ;;  %s2276_s7 = smov [#allocation2]  }
 0x45e   :  { %1334 = vrot.lane.b32.xlu0 %v1294_v18, %s2275_s18  ;;  %v1295_v23 = vadd.f32 %v1291_v20, %v1287_v19  ;;  %v1285_v1 = vsub.f32 1.0, %v2203_v24  ;;  %v1293_v31 = vmul.f32 %v2203_v24, %v2815_v30  ;;  %v1352_v26 = vsel %vm1351_vm2, %v1347_v32, %v1319_v36  ;;  %1914 = vmatprep.subr.bf16.mxu1 %v2046_v57  ;;  %s1604_s6 = sshll.u32 %s2276_s7, 4  ;;  %s1605_s6 = int_to_ptr.vmem [resolvable:$true] %s1604_s6 }
 0x45f   :  { %v1354_v50 = vsel %vm1351_vm2, %v1349_v2, %v1323_v34  ;;  %s2224_s21 = scalar_lea.vmem %s1605_s6, 512  ;;  %p2229_p1 = scmp.lt.s32.totalorder %s1605_s6, %s1605_s6 }
 0x460   :  { %1336 = vrot.lane.b32.xlu1 %v1295_v23, %s2275_s18  ;;  %p2225_p0 = scmp.ne.s32.totalorder %s1605_s6, %s2224_s21  ;;  %p2230_p2 = scmp.lt.s32.totalorder %s2224_s21, %s2224_s21 }
 0x461   :  { %v2205_v25 = vpop.eup %2204 }
 0x462   :  { %v1288_v27 = vmul.f32 %v2205_v25, %v1284_v56  ;;  %p2231_p3 = por %p2230_p2, %p2229_p1 }
 0x463   :  { %v2207_v28 = vpop.eup %2206 }
 0x464   :  { %v1296_v21 = vadd.f32 %v1292_v60, %v1288_v27  ;;  %v1289_v29 = vmul.f32 %v2207_v28, %v1285_v1  ;;  %p2232_p4 = pnand %p2231_p3, %p2225_p0 }
 0x466   :  { %1338 = vrot.lane.b32.xlu0 %v1296_v21, %s2275_s18  ;;  %v1297_v22 = vadd.f32 %v1293_v31, %v1289_v29 }
 0x468   :  { %1340 = vrot.lane.b32.xlu1 %v1297_v22, %s2275_s18 }
 0x4d0   :  { %v1335_v30 = vpop.permute.xlu0 %1334 }
 0x4d1   :  { %v1357_v45 = vsel %vm1356_vm3, %v1352_v26, %v1335_v30 }
 0x4d2   :  { %1361 = vst [vmem:[#allocation2] sm:$0xff] %v1357_v45  ;;  %v1337_v44 = vpop.permute.xlu1 %1336 }
 0x4d3   :  { %v1358_v53 = vsel %vm1356_vm3, %v1353_v9, %v1337_v44 }
 0x4d4   :  { %1362 = vst [vmem:[#allocation2 + $0x8] sm:$0xff] %v1358_v53  ;;  %v1365_v46 = vpack.c.bf16 %v1358_v53, %v1357_v45 }
 0x4d6   :  { %1910 = vmatprep.mubr.bf16.mxu1 %v1365_v46 }
 0x4d8   :  { %v1339_v39 = vpop.permute.xlu0 %1338 }
 0x4d9   :  { %v1359_v49 = vsel %vm1356_vm3, %v1354_v50, %v1339_v39 }
 0x4da   :  { %1363 = vst [vmem:[#allocation2 + $0x10] sm:$0xff] %v1359_v49  ;;  %v1341_v48 = vpop.permute.xlu1 %1340 }
 0x4db   :  { %v1360_v47 = vsel %vm1356_vm3, %v1355_v38, %v1341_v48 }
 0x4dc   :  { %1364 = vst [vmem:[#allocation2 + $0x18] sm:$0xff] %v1360_v47  ;;  %v1366_v41 = vpack.c.bf16 %v1360_v47, %v1359_v49 }
 0x4de   :  { %1911 = vmatmul.mubr.bf16.vlgmr.msra.gmra.mrb[32].mxu1 %v1366_v41 }
 0x4df   :  { %1915 = vmatpush3.bf16.msra.mxu1 %v2046_v57 }
 0x4e0   :  { %1916 = vmatprep.subr.bf16.mxu1 %v2047_v59 }
 0x4e3   :  { %1917 = vmatpush3.bf16.msra.mxu1 %v2047_v59 }
 0x5b1   :  { %v1912_v55 = vpop.f32.mrb[32].mxu1 }
 0x5b2   :  { %v1481_v61 = vadd.f32 %v1912_v55, %v1715_v40  ;;  %v1472_v42 = vpop.f32.mrb[33].mxu1 }
 0x5b3   :  { %v1473_v63 = vadd.f32 %v1715_v40, %v1472_v42  ;;  %v1913_v16 = vpop.f32.mrb[34].mxu1 }
 0x5b4   :  { %v1484_v0 = vadd.f32 %v1913_v16, %v1715_v40  ;;  %v1475_v14 = vpop.f32.mrb[35].mxu1  ;;  %v1489_v6 = vmax.f32 %v1481_v61, 0.0 }
 0x5b5   :  { %v1476_v5 = vadd.f32 %v1715_v40, %v1475_v14  ;;  %v1487_v8 = vmax.f32 %v1473_v63, 0.0 }
 0x5b6   :  { %v1490_v7 = vmax.f32 %v1484_v0, 0.0 }
 0x5b7   :  { %v1488_v10 = vmax.f32 %v1476_v5, 0.0 }
 0x5b8   :  { %v1492_v11 = vpack.c.bf16 %v1490_v7, %v1489_v6 }
 0x5b9   :  { %v1491_v37 = vpack.c.bf16 %v1488_v10, %v1487_v8 }
 0x5bb   :  { %1918 = vmatprep.mubr.msk.bf16.mxu1 %vm1346_vm1, %v1491_v37 }
 0x5bc   :  { %1919 = vmatmul.mubr.msk.bf16.vlgmr.msra.gmra.mrb[36].mxu1 %vm1346_vm1, %v1492_v11 }
 0x5bd   :  { %2235 = shalt.err (!%p2232_p4)
}
 0x5be   :  { %s2236_s23 = scalar_lea.hbm %s2937_s9, 512 }
 0x5bf   :  { %p2237_p5 = scmp.ne.s32.totalorder %s2937_s9, %s2236_s23  ;;  %p2240_p6 = scmp.lt.u32.totalorder %s2236_s23, %s2937_s9 }
 0x5c1   :  { %p2242_p7 = pnand %p2240_p6, %p2237_p5 }
 0x5c3   :  { %2245 = shalt.err (!%p2242_p7)
}
 0x5c4   :  { %s2277_s28 = smov 128   ;;  %s2278_s1 = smov 8   ;;  %v1724_v12 = vld [vmem:[%s2936_s8] ss:$0 sm:$0xff] }
 0x5c5   :  { %1610 = dma.vmem_to_hbm [thread:$0]  %s1605_s6, 512, %s2937_s9, [#allocation3], %s2277_s28, %s2277_s28, %s2278_s1  }
 0x5c6   :  { %s2279_s8 = smov [#allocation4]  }
 0x5c7   :  { %s1616_s9 = sshll.u32 %s2279_s8, 4  ;;  %s1617_s9 = int_to_ptr.vmem [resolvable:$true] %s1616_s9 }
 0x5c8   :  { %s2246_s13 = scalar_lea.vmem %s1617_s9, 512  ;;  %p2251_p9 = scmp.lt.s32.totalorder %s1617_s9, %s1617_s9 }
 0x5c9   :  { %p2247_p8 = scmp.ne.s32.totalorder %s1617_s9, %s2246_s13  ;;  %p2252_p10 = scmp.lt.s32.totalorder %s2246_s13, %s2246_s13 }
 0x5cb   :  { %p2253_p11 = por %p2252_p10, %p2251_p9 }
 0x5cd   :  { %p2254_p12 = pnand %p2253_p11, %p2247_p8 }
 0x68f   :  { %v1920_v13 = vpop.f32.mrb[36].mxu1 }
 0x690   :  { %v1565_v15 = vadd.f32 %v1920_v13, %v1724_v12  ;;  %v1556_v17 = vpop.f32.mrb[37].mxu1 }
 0x691   :  { %v1557_v62 = vadd.f32 %v1724_v12, %v1556_v17  ;;  %v1921_v18 = vpop.f32.mrb[38].mxu1 }
 0x692   :  { %v1731_v19 = vmul.f32 -1.442695, %v1565_v15  ;;  %v1568_v20 = vadd.f32 %v1921_v18, %v1724_v12  ;;  %v1559_v3 = vpop.f32.mrb[39].mxu1 }
 0x693   :  { %v1729_v23 = vmul.f32 -1.442695, %v1557_v62  ;;  %v1560_v24 = vadd.f32 %v1724_v12, %v1559_v3 }
 0x694   :  { %2208 = vpow2.f32 %v1731_v19  ;;  %v1732_v56 = vmul.f32 -1.442695, %v1568_v20 }
 0x695   :  { %2210 = vpow2.f32 %v1729_v23  ;;  %v1730_v25 = vmul.f32 -1.442695, %v1560_v24 }
 0x696   :  { %2212 = vpow2.f32 %v1732_v56 }
 0x697   :  { %2214 = vpow2.f32 %v1730_v25 }
 0x69e   :  { %v2209_v27 = vpop.eup %2208 }
 0x69f   :  { %v2211_v60 = vpop.eup %2210  ;;  %v1585_v1 = vadd.f32 1.0, %v2209_v27 }
 0x6a0   :  { %v2213_v28 = vpop.eup %2212  ;;  %v1583_v21 = vadd.f32 1.0, %v2211_v60 }
 0x6a1   :  { %v2215_v29 = vpop.eup %2214  ;;  %2216 = vrcp.f32 %v1585_v1  ;;  %v1586_v31 = vadd.f32 1.0, %v2213_v28 }
 0x6a2   :  { %2218 = vrcp.f32 %v1583_v21  ;;  %v1584_v22 = vadd.f32 1.0, %v2215_v29 }
 0x6a3   :  { %2220 = vrcp.f32 %v1586_v31 }
 0x6a4   :  { %2222 = vrcp.f32 %v1584_v22 }
 0x6ab   :  { %v2217_v35 = vpop.eup %2216 }
 0x6ac   :  { %v2219_v33 = vpop.eup %2218  ;;  %1597 = vst.msk [vmem:[#allocation4 + $0x10] sm:$0xff] %vm130_vm0, %v2217_v35 }
 0x6ad   :  { %v2221_v52 = vpop.eup %2220  ;;  %1595 = vst.msk [vmem:[#allocation4] sm:$0xff] %vm130_vm0, %v2219_v33 }
 0x6ae   :  { %v2223_v54 = vpop.eup %2222  ;;  %1598 = vst.msk [vmem:[#allocation4 + $0x18] sm:$0xff] %vm130_vm0, %v2221_v52 }
 0x6af   :  { %1596 = vst.msk [vmem:[#allocation4 + $0x8] sm:$0xff] %vm130_vm0, %v2223_v54 }
 0x6b0   :  { %2257 = shalt.err (!%p2254_p12)
}
 0x6b1   :  { %s2258_s16 = scalar_lea.hbm %s2938_s10, 512 }
 0x6b2   :  { %p2259_p13 = scmp.ne.s32.totalorder %s2938_s10, %s2258_s16  ;;  %p2262_p0 = scmp.lt.u32.totalorder %s2258_s16, %s2938_s10 }
 0x6b4   :  { %p2264_p1 = pnand %p2262_p0, %p2259_p13 }
 0x6b6   :  { %2267 = shalt.err (!%p2264_p1)
}
 0x6b7   :  { %1622 = dma.vmem_to_hbm [thread:$0]  %s1617_s9, 512, %s2938_s10, [#allocation5], %s2277_s28, %s2277_s28, %s2278_s1  }
 0x6b8   :  { %2268 = dma.done.wait [#allocation3], 512  }
 0x6b9   :  { %2269 = vsyncadd [#allocation3], 4294966784 }
 0x6ba   :  { %2270 = dma.done.wait [#allocation5], 512  }
 0x6bb   :  { %2271 = vsyncadd [#allocation5], 4294966784 }
 0x6bc   :  { %1629 = vsyncpa [#allocation3], 1 }
 0x6bd   :  { %1630 = vsyncpa [#allocation5], 1 }

</bundles_post_ra>
